<compile_context>
chip_gen: v6e
topology: v6e:2x2x1
jax: 0.10.0
libtpu: 0.0.40
codegen_flags: <defaults>
</compile_context>

<pallas_src>
import functools

import jax
import jax.numpy as jnp
from jax.experimental import pallas as pl
from jax.experimental.pallas import tpu as pltpu


def _round_up(x, m):
    return (x + m - 1) // m * m


def _adaptive_weight_kernel(x_ref, w1_ref, b1_ref, g_ref, beta_ref,
                            w2_ref, b2_ref, o_ref, acc_ref,
                            *, inv_hw, hw_total, thw, needs_mask, eps):
    # x_ref:   (tb, C, thw)    one spatial tile of one batch tile
    # w1_ref:  (C, C4)         b1_ref/g_ref/beta_ref: (1, C4)
    # w2_ref:  (C4, CKK_pad)   b2_ref: (1, CKK_pad)
    # o_ref:   (tb, CKK_pad)   acc_ref: (tb, C, 128) lane-wide running sum
    hw = pl.program_id(1)
    last = pl.num_programs(1) - 1
    nchunks = thw // 128  # static

    @pl.when(hw == 0)
    def _():
        acc_ref[...] = jnp.zeros_like(acc_ref)

    def accumulate(masked):
        x = x_ref[...].astype(jnp.float32)
        if masked:
            # Tail spatial tile: zero out-of-bounds lanes (contents unspecified).
            lane = jax.lax.broadcasted_iota(jnp.int32, x.shape, dimension=2)
            valid = (hw * thw + lane) < hw_total
            x = jnp.where(valid, x, 0.0)
        # Lane-preserving partial sum: pure VPU adds over 128-lane chunks,
        # no cross-lane (XLU) reduce and no relayout in the steady-state loop.
        partial = x[:, :, 0:128]
        for j in range(1, nchunks):
            partial = partial + x[:, :, j * 128:(j + 1) * 128]
        acc_ref[...] += partial

    if needs_mask:
        @pl.when(hw < last)
        def _():
            accumulate(False)

        @pl.when(hw == last)
        def _():
            accumulate(True)
    else:
        accumulate(False)

    @pl.when(hw == last)
    def _():
        # Single cross-lane reduce + AdaptiveAvgPool2d((1,1)) divide by true H*W.
        pooled = jnp.sum(acc_ref[...], axis=-1) * inv_hw                 # (tb, C)

        # conv1 (1x1 conv == matmul over channels) + ReLU
        h = jnp.dot(pooled, w1_ref[...], preferred_element_type=jnp.float32)
        h = jnp.maximum(h + b1_ref[...], 0.0)                            # (tb, C4)

        # LayerNorm over the channel dim (channels_first), eps = 1e-6
        mu = jnp.mean(h, axis=-1, keepdims=True)
        d = h - mu
        var = jnp.mean(d * d, axis=-1, keepdims=True)
        hn = d * jax.lax.rsqrt(var + eps)
        hn = hn * g_ref[...] + beta_ref[...]                             # (tb, C4)

        # conv2 (1x1 conv == matmul) + ReLU
        y = jnp.dot(hn, w2_ref[...], preferred_element_type=jnp.float32)
        y = jnp.maximum(y + b2_ref[...], 0.0)                            # (tb, CKK_pad)

        o_ref[...] = y.astype(o_ref.dtype)


def adaptive_weight_module(x, params, K, *, tb=8, thw=None, eps=1e-6):
    """x: (B, C, H, W) float32/bfloat16 NCHW. Returns (B*C, 1, K, K) float32."""
    B, C, H, W = x.shape
    C4 = C // 4
    CKK = C * K * K
    HW = H * W
    w1, b1, gamma, beta, w2, b2 = params

    # ---- lane-dense output: pad C*K*K up to a multiple of 128 (weights only) --
    CKK_pad = _round_up(CKK, 128)
    if CKK_pad != CKK:
        w2p = jnp.pad(w2, ((0, 0), (0, CKK_pad - CKK)))
        b2p = jnp.pad(b2, ((0, 0), (0, CKK_pad - CKK)))
    else:
        w2p, b2p = w2, b2

    # ---- batch tile: sublane-aligned, never stream padded batch rows ----------
    # tb=8 keeps >=2 steps on the "parallel" grid axis whenever B > 8 (v7x 2 TCs).
    if B >= 8:
        tb = max(8, (min(tb, B) // 8) * 8)
    else:
        tb = B

    itemsize = jnp.dtype(x.dtype).itemsize

    # ---- per-generation VMEM budget -------------------------------------------
    try:
        vmem_cap = int(pltpu.get_tpu_info().vmem_capacity_bytes)  # 128 MiB v5e/v6e, 64 MiB v7x
    except Exception:
        vmem_cap = 64 << 20  # conservative fallback (v7x)

    param_bytes = (C * C4 + 3 * C4 + C4 * CKK_pad + CKK_pad) * 4
    out_tile_bytes = tb * CKK_pad * 4
    acc_bytes = tb * C * 128 * 4
    fixed = 2 * param_bytes + 2 * out_tile_bytes + acc_bytes + (2 << 20)

    # ---- spatial tile: VMEM-budget-driven, multiple of 128, no HBM padding ----
    if thw is None:
        x_budget = min((vmem_cap * 3) // 8,                      # ~24 MiB v7x, ~48 MiB v5e/v6e
                       max(1 << 20, (int(vmem_cap * 0.9) - fixed) // 2))
        thw = (x_budget // (tb * C * itemsize)) // 128 * 128
        thw = max(128, min(thw, 16384, _round_up(HW, 128)))
    else:
        thw = max(128, min(_round_up(thw, 128), _round_up(HW, 128)))

    grid = (pl.cdiv(B, tb), pl.cdiv(HW, thw))
    needs_mask = (HW % thw) != 0

    # Row-major reshape (B, C, H, W) -> (B, C, HW): free, no HBM rewrite.
    x_flat = x.reshape(B, C, HW)

    tile_x_bytes = tb * C * thw * itemsize
    need = 2 * tile_x_bytes + fixed
    vmem_cap_lim = min(100 << 20, (vmem_cap * 7) // 8)           # ~100 MiB / ~56 MiB (v7x)
    vmem_limit = int(min(max(int(need * 1.25), 16 << 20), vmem_cap_lim))

    kern = functools.partial(_adaptive_weight_kernel,
                             inv_hw=1.0 / float(HW), hw_total=HW, thw=thw,
                             needs_mask=needs_mask, eps=eps)

    out = pl.pallas_call(
        kern,
        out_shape=jax.ShapeDtypeStruct((B, CKK_pad), jnp.float32),
        grid_spec=pltpu.PrefetchScalarGridSpec(
            num_scalar_prefetch=0,
            grid=grid,
            in_specs=[
                # x: tiled over (batch, spatial); channels kept whole.
                pl.BlockSpec((tb, C, thw), lambda b, s: (b, 0, s)),
                # Params: constant index_map -> stay resident across the grid.
                pl.BlockSpec((C, C4), lambda b, s: (0, 0)),
                pl.BlockSpec((1, C4), lambda b, s: (0, 0)),
                pl.BlockSpec((1, C4), lambda b, s: (0, 0)),
                pl.BlockSpec((1, C4), lambda b, s: (0, 0)),
                pl.BlockSpec((C4, CKK_pad), lambda b, s: (0, 0)),
                pl.BlockSpec((1, CKK_pad), lambda b, s: (0, 0)),
            ],
            # Output block constant across the spatial (reduction) axis.
            out_specs=pl.BlockSpec((tb, CKK_pad), lambda b, s: (b, 0)),
            scratch_shapes=[pltpu.VMEM((tb, C, 128), jnp.float32)],
        ),
        compiler_params=pltpu.CompilerParams(
            dimension_semantics=("parallel", "arbitrary"),
            vmem_limit_bytes=vmem_limit,
        ),
    )(x_flat, w1, b1, gamma, beta, w2p, b2p)

    out = out[:, :CKK]
    # x.view(B*C, 1, K, K) in PyTorch (row-major) == this reshape
    return out.reshape(B * C, 1, K, K)


def init_params(key, C, K):
    """Deterministic synthetic parameters matching the PyTorch module shapes.

    conv1.weight: (C//4, C, 1, 1) -> stored transposed as (C, C//4) for matmul
    conv2.weight: (C*K*K, C//4, 1, 1) -> stored as (C//4, C*K*K)
    LayerNorm: weight/bias of shape (C//4,) -> stored as (1, C//4)
    """
    C4 = C // 4
    CKK = C * K * K
    k1, k2, k3, k4 = jax.random.split(key, 4)
    w1 = jax.random.normal(k1, (C, C4), jnp.float32) * 0.1
    b1 = jax.random.normal(k2, (1, C4), jnp.float32) * 0.05
    gamma = jnp.ones((1, C4), jnp.float32)
    beta = jnp.zeros((1, C4), jnp.float32)
    w2 = jax.random.normal(k3, (C4, CKK), jnp.float32) * 0.1
    b2 = jax.random.normal(k4, (1, CKK), jnp.float32) * 0.05
    return (w1, b1, gamma, beta, w2, b2)


def reference_forward(x, params, K, eps=1e-6):
    """Pure-JAX reference mirroring the PyTorch module semantics."""
    w1, b1, gamma, beta, w2, b2 = params
    B, C, _, _ = x.shape
    pooled = jnp.mean(x.astype(jnp.float32), axis=(2, 3))   # (B, C)
    h = jnp.maximum(pooled @ w1 + b1, 0.0)                  # (B, C//4)
    mu = jnp.mean(h, axis=-1, keepdims=True)
    var = jnp.mean((h - mu) ** 2, axis=-1, keepdims=True)
    hn = (h - mu) / jnp.sqrt(var + eps) * gamma + beta
    y = jnp.maximum(hn @ w2 + b2, 0.0)                      # (B, C*K*K)
    return y.reshape(B * C, 1, K, K)


if __name__ == "__main__":
    # B=12 (not a multiple of 8) exercises the partial tail batch tile;
    # H=W=36 -> HW=1296 (not a multiple of 128) exercises the in-kernel
    # spatial tail mask.  The second run forces thw=512 so the multi-step
    # pipelined reduction, the accumulator reset and the pl.when finalize
    # path are all exercised.
    B, C, H, W = 12, 32, 36, 36
    K = 3

    key = jax.random.PRNGKey(0)
    kx, kp = jax.random.split(key)
    x = jax.random.normal(kx, (B, C, H, W), jnp.float32)
    params = init_params(kp, C, K)

    ref = reference_forward(x, params, K)

    # Default (VMEM-budget-driven) tiling.
    out1 = jax.block_until_ready(adaptive_weight_module(x, params, K))
    assert out1.shape == (B * C, 1, K, K), out1.shape
    assert jnp.allclose(out1, ref, atol=1e-4, rtol=1e-4), "mismatch (default tiling)"

    # Forced multi-step spatial reduction (3 spatial tiles, masked tail).
    out2 = jax.block_until_ready(adaptive_weight_module(x, params, K, thw=512))
    assert jnp.allclose(out2, ref, atol=1e-4, rtol=1e-4), "mismatch (thw=512)"

    print("KERNEL_OK")
</pallas_src>

<mosaic_0001>
module attributes {stable_mosaic.version = 11 : i64} {
  func.func @_adaptive_weight_kernel(%arg0: i32, %arg1: i32, %arg2: memref<8x32x1408xf32, #tpu.memory_space<vmem>>, %arg3: memref<32x8xf32, #tpu.memory_space<vmem>>, %arg4: memref<1x8xf32, #tpu.memory_space<vmem>>, %arg5: memref<1x8xf32, #tpu.memory_space<vmem>>, %arg6: memref<1x8xf32, #tpu.memory_space<vmem>>, %arg7: memref<8x384xf32, #tpu.memory_space<vmem>>, %arg8: memref<1x384xf32, #tpu.memory_space<vmem>>, %arg9: memref<8x384xf32, #tpu.memory_space<vmem>>, %arg10: memref<8x32x128xf32, #tpu.memory_space<vmem>>) attributes {dimension_semantics = [#tpu.dimension_semantics<parallel>, #tpu.dimension_semantics<arbitrary>], iteration_bounds = array<i64: 2, 1>, scalar_prefetch = 0 : i64, scratch_operands = 1 : i64, tpu.core_type = #tpu.core_type<tc>, window_params = [{transform_indices = @transform_0, window_bounds = array<i64: 8, 32, 1408>}, {pipeline_mode = #tpu.pipeline_mode<synchronous>, transform_indices = @transform_1, window_bounds = array<i64: 32, 8>}, {pipeline_mode = #tpu.pipeline_mode<synchronous>, transform_indices = @transform_2, window_bounds = array<i64: 1, 8>}, {pipeline_mode = #tpu.pipeline_mode<synchronous>, transform_indices = @transform_3, window_bounds = array<i64: 1, 8>}, {pipeline_mode = #tpu.pipeline_mode<synchronous>, transform_indices = @transform_4, window_bounds = array<i64: 1, 8>}, {pipeline_mode = #tpu.pipeline_mode<synchronous>, transform_indices = @transform_5, window_bounds = array<i64: 8, 384>}, {pipeline_mode = #tpu.pipeline_mode<synchronous>, transform_indices = @transform_6, window_bounds = array<i64: 1, 384>}, {transform_indices = @transform_7, window_bounds = array<i64: 8, 384>}]} {
    %c0_i32 = arith.constant 0 : i32
    %0 = arith.cmpi eq, %arg1, %c0_i32 : i32
    %1 = arith.extui %0 : i1 to i32
    %c0_i32_0 = arith.constant 0 : i32
    %2 = arith.cmpi ne, %1, %c0_i32_0 : i32
    scf.if %2 {
      %cst = arith.constant 0.000000e+00 : f32
      %12 = vector.broadcast %cst : f32 to vector<8x32x128xf32>
      %c0 = arith.constant 0 : index
      %c0_7 = arith.constant 0 : index
      %c0_8 = arith.constant 0 : index
      %13 = vector.load %arg10[%c0, %c0_7, %c0_8] : memref<8x32x128xf32, #tpu.memory_space<vmem>>, vector<8x32x128xf32>
      tpu.vector_store %arg10[%c0, %c0_7, %c0_8], %12 {strides = array<i32>} : memref<8x32x128xf32, #tpu.memory_space<vmem>>, vector<8x32x128xf32>,
    } else {
    }
    %c0_i32_1 = arith.constant 0 : i32
    %3 = arith.cmpi slt, %arg1, %c0_i32_1 : i32
    %4 = arith.extui %3 : i1 to i32
    %c0_i32_2 = arith.constant 0 : i32
    %5 = arith.cmpi ne, %4, %c0_i32_2 : i32
    scf.if %5 {
      %c0 = arith.constant 0 : index
      %c0_7 = arith.constant 0 : index
      %c0_8 = arith.constant 0 : index
      %12 = vector.load %arg2[%c0, %c0_7, %c0_8] : memref<8x32x1408xf32, #tpu.memory_space<vmem>>, vector<8x32x1408xf32>
      %13 = vector.extract_strided_slice %12 {offsets = [0, 0, 0], sizes = [8, 32, 128], strides = [1, 1, 1]} : vector<8x32x1408xf32> to vector<8x32x128xf32>
      %14 = vector.extract_strided_slice %12 {offsets = [0, 0, 128], sizes = [8, 32, 128], strides = [1, 1, 1]} : vector<8x32x1408xf32> to vector<8x32x128xf32>
      %15 = arith.addf %13, %14 : vector<8x32x128xf32>
      %16 = vector.extract_strided_slice %12 {offsets = [0, 0, 256], sizes = [8, 32, 128], strides = [1, 1, 1]} : vector<8x32x1408xf32> to vector<8x32x128xf32>
      %17 = arith.addf %15, %16 : vector<8x32x128xf32>
      %18 = vector.extract_strided_slice %12 {offsets = [0, 0, 384], sizes = [8, 32, 128], strides = [1, 1, 1]} : vector<8x32x1408xf32> to vector<8x32x128xf32>
      %19 = arith.addf %17, %18 : vector<8x32x128xf32>
      %20 = vector.extract_strided_slice %12 {offsets = [0, 0, 512], sizes = [8, 32, 128], strides = [1, 1, 1]} : vector<8x32x1408xf32> to vector<8x32x128xf32>
      %21 = arith.addf %19, %20 : vector<8x32x128xf32>
      %22 = vector.extract_strided_slice %12 {offsets = [0, 0, 640], sizes = [8, 32, 128], strides = [1, 1, 1]} : vector<8x32x1408xf32> to vector<8x32x128xf32>
      %23 = arith.addf %21, %22 : vector<8x32x128xf32>
      %24 = vector.extract_strided_slice %12 {offsets = [0, 0, 768], sizes = [8, 32, 128], strides = [1, 1, 1]} : vector<8x32x1408xf32> to vector<8x32x128xf32>
      %25 = arith.addf %23, %24 : vector<8x32x128xf32>
      %26 = vector.extract_strided_slice %12 {offsets = [0, 0, 896], sizes = [8, 32, 128], strides = [1, 1, 1]} : vector<8x32x1408xf32> to vector<8x32x128xf32>
      %27 = arith.addf %25, %26 : vector<8x32x128xf32>
      %28 = vector.extract_strided_slice %12 {offsets = [0, 0, 1024], sizes = [8, 32, 128], strides = [1, 1, 1]} : vector<8x32x1408xf32> to vector<8x32x128xf32>
      %29 = arith.addf %27, %28 : vector<8x32x128xf32>
      %30 = vector.extract_strided_slice %12 {offsets = [0, 0, 1152], sizes = [8, 32, 128], strides = [1, 1, 1]} : vector<8x32x1408xf32> to vector<8x32x128xf32>
      %31 = arith.addf %29, %30 : vector<8x32x128xf32>
      %32 = vector.extract_strided_slice %12 {offsets = [0, 0, 1280], sizes = [8, 32, 128], strides = [1, 1, 1]} : vector<8x32x1408xf32> to vector<8x32x128xf32>
      %33 = arith.addf %31, %32 : vector<8x32x128xf32>
      %c0_9 = arith.constant 0 : index
      %c0_10 = arith.constant 0 : index
      %c0_11 = arith.constant 0 : index
      %34 = vector.load %arg10[%c0_9, %c0_10, %c0_11] : memref<8x32x128xf32, #tpu.memory_space<vmem>>, vector<8x32x128xf32>
      %35 = arith.addf %34, %33 : vector<8x32x128xf32>
      %c0_12 = arith.constant 0 : index
      %c0_13 = arith.constant 0 : index
      %c0_14 = arith.constant 0 : index
      %36 = vector.load %arg10[%c0_12, %c0_13, %c0_14] : memref<8x32x128xf32, #tpu.memory_space<vmem>>, vector<8x32x128xf32>
      tpu.vector_store %arg10[%c0_12, %c0_13, %c0_14], %35 {strides = array<i32>} : memref<8x32x128xf32, #tpu.memory_space<vmem>>, vector<8x32x128xf32>,
    } else {
    }
    %c0_i32_3 = arith.constant 0 : i32
    %6 = arith.cmpi eq, %arg1, %c0_i32_3 : i32
    %7 = arith.extui %6 : i1 to i32
    %c0_i32_4 = arith.constant 0 : i32
    %8 = arith.cmpi ne, %7, %c0_i32_4 : i32
    scf.if %8 {
      %c0 = arith.constant 0 : index
      %c0_7 = arith.constant 0 : index
      %c0_8 = arith.constant 0 : index
      %12 = vector.load %arg2[%c0, %c0_7, %c0_8] : memref<8x32x1408xf32, #tpu.memory_space<vmem>>, vector<8x32x1408xf32>
      %13 = tpu.iota {dimensions = array<i32: 2>} : vector<8x32x1408xi32>
      %c1408_i32 = arith.constant 1408 : i32
      %14 = arith.muli %arg1, %c1408_i32 : i32
      %15 = vector.broadcast %14 : i32 to vector<8x32x1408xi32>
      %16 = arith.addi %15, %13 : vector<8x32x1408xi32>
      %c1296_i32 = arith.constant 1296 : i32
      %17 = vector.broadcast %c1296_i32 : i32 to vector<8x32x1408xi32>
      %18 = arith.cmpi slt, %16, %17 : vector<8x32x1408xi32>
      %cst = arith.constant 0.000000e+00 : f32
      %19 = vector.broadcast %cst : f32 to vector<8x32x1408xf32>
      %20 = arith.select %18, %12, %19 : vector<8x32x1408xi1>, vector<8x32x1408xf32>
      %21 = vector.extract_strided_slice %20 {offsets = [0, 0, 0], sizes = [8, 32, 128], strides = [1, 1, 1]} : vector<8x32x1408xf32> to vector<8x32x128xf32>
      %22 = vector.extract_strided_slice %20 {offsets = [0, 0, 128], sizes = [8, 32, 128], strides = [1, 1, 1]} : vector<8x32x1408xf32> to vector<8x32x128xf32>
      %23 = arith.addf %21, %22 : vector<8x32x128xf32>
      %24 = vector.extract_strided_slice %20 {offsets = [0, 0, 256], sizes = [8, 32, 128], strides = [1, 1, 1]} : vector<8x32x1408xf32> to vector<8x32x128xf32>
      %25 = arith.addf %23, %24 : vector<8x32x128xf32>
      %26 = vector.extract_strided_slice %20 {offsets = [0, 0, 384], sizes = [8, 32, 128], strides = [1, 1, 1]} : vector<8x32x1408xf32> to vector<8x32x128xf32>
      %27 = arith.addf %25, %26 : vector<8x32x128xf32>
      %28 = vector.extract_strided_slice %20 {offsets = [0, 0, 512], sizes = [8, 32, 128], strides = [1, 1, 1]} : vector<8x32x1408xf32> to vector<8x32x128xf32>
      %29 = arith.addf %27, %28 : vector<8x32x128xf32>
      %30 = vector.extract_strided_slice %20 {offsets = [0, 0, 640], sizes = [8, 32, 128], strides = [1, 1, 1]} : vector<8x32x1408xf32> to vector<8x32x128xf32>
      %31 = arith.addf %29, %30 : vector<8x32x128xf32>
      %32 = vector.extract_strided_slice %20 {offsets = [0, 0, 768], sizes = [8, 32, 128], strides = [1, 1, 1]} : vector<8x32x1408xf32> to vector<8x32x128xf32>
      %33 = arith.addf %31, %32 : vector<8x32x128xf32>
      %34 = vector.extract_strided_slice %20 {offsets = [0, 0, 896], sizes = [8, 32, 128], strides = [1, 1, 1]} : vector<8x32x1408xf32> to vector<8x32x128xf32>
      %35 = arith.addf %33, %34 : vector<8x32x128xf32>
      %36 = vector.extract_strided_slice %20 {offsets = [0, 0, 1024], sizes = [8, 32, 128], strides = [1, 1, 1]} : vector<8x32x1408xf32> to vector<8x32x128xf32>
      %37 = arith.addf %35, %36 : vector<8x32x128xf32>
      %38 = vector.extract_strided_slice %20 {offsets = [0, 0, 1152], sizes = [8, 32, 128], strides = [1, 1, 1]} : vector<8x32x1408xf32> to vector<8x32x128xf32>
      %39 = arith.addf %37, %38 : vector<8x32x128xf32>
      %40 = vector.extract_strided_slice %20 {offsets = [0, 0, 1280], sizes = [8, 32, 128], strides = [1, 1, 1]} : vector<8x32x1408xf32> to vector<8x32x128xf32>
      %41 = arith.addf %39, %40 : vector<8x32x128xf32>
      %c0_9 = arith.constant 0 : index
      %c0_10 = arith.constant 0 : index
      %c0_11 = arith.constant 0 : index
      %42 = vector.load %arg10[%c0_9, %c0_10, %c0_11] : memref<8x32x128xf32, #tpu.memory_space<vmem>>, vector<8x32x128xf32>
      %43 = arith.addf %42, %41 : vector<8x32x128xf32>
      %c0_12 = arith.constant 0 : index
      %c0_13 = arith.constant 0 : index
      %c0_14 = arith.constant 0 : index
      %44 = vector.load %arg10[%c0_12, %c0_13, %c0_14] : memref<8x32x128xf32, #tpu.memory_space<vmem>>, vector<8x32x128xf32>
      tpu.vector_store %arg10[%c0_12, %c0_13, %c0_14], %43 {strides = array<i32>} : memref<8x32x128xf32, #tpu.memory_space<vmem>>, vector<8x32x128xf32>,
    } else {
    }
    %c0_i32_5 = arith.constant 0 : i32
    %9 = arith.cmpi eq, %arg1, %c0_i32_5 : i32
    %10 = arith.extui %9 : i1 to i32
    %c0_i32_6 = arith.constant 0 : i32
    %11 = arith.cmpi ne, %10, %c0_i32_6 : i32
    scf.if %11 {
      %c0 = arith.constant 0 : index
      %c0_7 = arith.constant 0 : index
      %c0_8 = arith.constant 0 : index
      %12 = vector.load %arg10[%c0, %c0_7, %c0_8] : memref<8x32x128xf32, #tpu.memory_space<vmem>>, vector<8x32x128xf32>
      %cst = arith.constant dense<0.000000e+00> : vector<8x32xf32>
      %13 = vector.multi_reduction <add>, %12, %cst [2] : vector<8x32x128xf32> to vector<8x32xf32>
      %cst_9 = arith.constant 7.71604944E-4 : f32
      %14 = vector.broadcast %cst_9 : f32 to vector<8x32xf32>
      %15 = arith.mulf %13, %14 : vector<8x32xf32>
      %c0_10 = arith.constant 0 : index
      %c0_11 = arith.constant 0 : index
      %16 = vector.load %arg3[%c0_10, %c0_11] : memref<32x8xf32, #tpu.memory_space<vmem>>, vector<32x8xf32>
      %cst_12 = arith.constant dense<0.000000e+00> : vector<8x8xf32>
      %17 = tpu.matmul %15, %16, %cst_12 {dimension_numbers = #tpu.dot_dimension_numbers<[1], [0], [0], [1], [0, 0, 1, 1], [], []>} : vector<8x32xf32>, vector<32x8xf32>, vector<8x8xf32> -> vector<8x8xf32>
      %c0_13 = arith.constant 0 : index
      %c0_14 = arith.constant 0 : index
      %18 = vector.load %arg4[%c0_13, %c0_14] : memref<1x8xf32, #tpu.memory_space<vmem>>, vector<1x8xf32>
      %19 = vector.broadcast %18 : vector<1x8xf32> to vector<8x8xf32>
      %20 = arith.addf %17, %19 : vector<8x8xf32>
      %cst_15 = arith.constant 0.000000e+00 : f32
      %21 = vector.broadcast %cst_15 : f32 to vector<8x8xf32>
      %22 = arith.maximumf %20, %21 : vector<8x8xf32>
      %cst_16 = arith.constant dense<0.000000e+00> : vector<8xf32>
      %23 = vector.multi_reduction <add>, %22, %cst_16 [1] : vector<8x8xf32> to vector<8xf32>
      %24 = vector.shape_cast %23 : vector<8xf32> to vector<8x1xf32>
      %cst_17 = arith.constant 8.000000e+00 : f32
      %25 = vector.broadcast %cst_17 : f32 to vector<8x1xf32>
      %26 = arith.divf %24, %25 : vector<8x1xf32>
      %27 = vector.broadcast %26 : vector<8x1xf32> to vector<8x8xf32>
      %28 = arith.subf %22, %27 : vector<8x8xf32>
      %29 = arith.mulf %28, %28 : vector<8x8xf32>
      %cst_18 = arith.constant dense<0.000000e+00> : vector<8xf32>
      %30 = vector.multi_reduction <add>, %29, %cst_18 [1] : vector<8x8xf32> to vector<8xf32>
      %31 = vector.shape_cast %30 : vector<8xf32> to vector<8x1xf32>
      %cst_19 = arith.constant 8.000000e+00 : f32
      %32 = vector.broadcast %cst_19 : f32 to vector<8x1xf32>
      %33 = arith.divf %31, %32 : vector<8x1xf32>
      %cst_20 = arith.constant 9.99999997E-7 : f32
      %34 = vector.broadcast %cst_20 : f32 to vector<8x1xf32>
      %35 = arith.addf %33, %34 : vector<8x1xf32>
      %36 = math.rsqrt %35 : vector<8x1xf32>
      %37 = vector.broadcast %36 : vector<8x1xf32> to vector<8x8xf32>
      %38 = arith.mulf %28, %37 : vector<8x8xf32>
      %c0_21 = arith.constant 0 : index
      %c0_22 = arith.constant 0 : index
      %39 = vector.load %arg5[%c0_21, %c0_22] : memref<1x8xf32, #tpu.memory_space<vmem>>, vector<1x8xf32>
      %40 = vector.broadcast %39 : vector<1x8xf32> to vector<8x8xf32>
      %41 = arith.mulf %38, %40 : vector<8x8xf32>
      %c0_23 = arith.constant 0 : index
      %c0_24 = arith.constant 0 : index
      %42 = vector.load %arg6[%c0_23, %c0_24] : memref<1x8xf32, #tpu.memory_space<vmem>>, vector<1x8xf32>
      %43 = vector.broadcast %42 : vector<1x8xf32> to vector<8x8xf32>
      %44 = arith.addf %41, %43 : vector<8x8xf32>
      %c0_25 = arith.constant 0 : index
      %c0_26 = arith.constant 0 : index
      %45 = vector.load %arg7[%c0_25, %c0_26] : memref<8x384xf32, #tpu.memory_space<vmem>>, vector<8x384xf32>
      %cst_27 = arith.constant dense<0.000000e+00> : vector<8x384xf32>
      %46 = tpu.matmul %44, %45, %cst_27 {dimension_numbers = #tpu.dot_dimension_numbers<[1], [0], [0], [1], [0, 0, 1, 1], [], []>} : vector<8x8xf32>, vector<8x384xf32>, vector<8x384xf32> -> vector<8x384xf32>
      %c0_28 = arith.constant 0 : index
      %c0_29 = arith.constant 0 : index
      %47 = vector.load %arg8[%c0_28, %c0_29] : memref<1x384xf32, #tpu.memory_space<vmem>>, vector<1x384xf32>
      %48 = vector.broadcast %47 : vector<1x384xf32> to vector<8x384xf32>
      %49 = arith.addf %46, %48 : vector<8x384xf32>
      %cst_30 = arith.constant 0.000000e+00 : f32
      %50 = vector.broadcast %cst_30 : f32 to vector<8x384xf32>
      %51 = arith.maximumf %49, %50 : vector<8x384xf32>
      %c0_31 = arith.constant 0 : index
      %c0_32 = arith.constant 0 : index
      %52 = vector.load %arg9[%c0_31, %c0_32] : memref<8x384xf32, #tpu.memory_space<vmem>>, vector<8x384xf32>
      tpu.vector_store %arg9[%c0_31, %c0_32], %51 {strides = array<i32>} : memref<8x384xf32, #tpu.memory_space<vmem>>, vector<8x384xf32>,
    } else {
    }
    return
  }
  func.func @transform_0(%arg0: i32, %arg1: i32) -> (i32, i32, i32) {
    %c0_i32 = arith.constant 0 : i32
    %c0_i32_0 = arith.constant 0 : i32
    return %arg0, %c0_i32, %arg1 : i32, i32, i32
  }
  func.func @transform_1(%arg0: i32, %arg1: i32) -> (i32, i32) {
    %c0_i32 = arith.constant 0 : i32
    %c0_i32_0 = arith.constant 0 : i32
    %c0_i32_1 = arith.constant 0 : i32
    return %c0_i32, %c0_i32_0 : i32, i32
  }
  func.func @transform_2(%arg0: i32, %arg1: i32) -> (i32, i32) {
    %c0_i32 = arith.constant 0 : i32
    %c0_i32_0 = arith.constant 0 : i32
    %c0_i32_1 = arith.constant 0 : i32
    return %c0_i32, %c0_i32_0 : i32, i32
  }
  func.func @transform_3(%arg0: i32, %arg1: i32) -> (i32, i32) {
    %c0_i32 = arith.constant 0 : i32
    %c0_i32_0 = arith.constant 0 : i32
    %c0_i32_1 = arith.constant 0 : i32
    return %c0_i32, %c0_i32_0 : i32, i32
  }
  func.func @transform_4(%arg0: i32, %arg1: i32) -> (i32, i32) {
    %c0_i32 = arith.constant 0 : i32
    %c0_i32_0 = arith.constant 0 : i32
    %c0_i32_1 = arith.constant 0 : i32
    return %c0_i32, %c0_i32_0 : i32, i32
  }
  func.func @transform_5(%arg0: i32, %arg1: i32) -> (i32, i32) {
    %c0_i32 = arith.constant 0 : i32
    %c0_i32_0 = arith.constant 0 : i32
    %c0_i32_1 = arith.constant 0 : i32
    return %c0_i32, %c0_i32_0 : i32, i32
  }
  func.func @transform_6(%arg0: i32, %arg1: i32) -> (i32, i32) {
    %c0_i32 = arith.constant 0 : i32
    %c0_i32_0 = arith.constant 0 : i32
    %c0_i32_1 = arith.constant 0 : i32
    return %c0_i32, %c0_i32_0 : i32, i32
  }
  func.func @transform_7(%arg0: i32, %arg1: i32) -> (i32, i32) {
    %c0_i32 = arith.constant 0 : i32
    %c0_i32_0 = arith.constant 0 : i32
    return %arg0, %c0_i32 : i32, i32
  }
}

</mosaic_0001>

<bundles_post_ra>
// kernel: tpu_custom_call.1
= control target key start
LH: loop header
LB: loop body
LE: loop exit
PB: predicated region body
PF: predicated region fallthrough
CT: control target
= control target key end

     0   :  { %12 = vsyncpa [#allocation4], 0  ;;  %s4412_s0 = inlined_call_operand.hbm [shape: f32[12,32,1296], index: 0, kind: input, shape index: {}]   ;;  %s4413_s1 = inlined_call_operand.vmem [shape: f32[32,8], index: 1, kind: input, shape index: {}]   ;;  %s4414_s2 = inlined_call_operand.hbm [shape: f32[1,8], index: 2, kind: input, shape index: {}]   ;;  %s4415_s3 = inlined_call_operand.hbm [shape: f32[1,8], index: 3, kind: input, shape index: {}]   ;;  %s4416_s4 = inlined_call_operand.hbm [shape: f32[1,8], index: 4, kind: input, shape index: {}]   ;;  %s4417_s5 = inlined_call_operand.hbm [shape: f32[8,384], index: 5, kind: input, shape index: {}]   ;;  %s4418_s6 = inlined_call_operand.hbm [shape: f32[1,384], index: 6, kind: input, shape index: {}]   ;;  %s4419_s7 = inlined_call_operand.hbm [shape: f32[12,384], index: 7, kind: output, shape index: {}]  }
   0x1   :  { %14 = vsyncpa [#allocation4 + $0x1], 0 }
   0x2   :  { %15 = vsyncpa [#allocation7], 0 }
   0x3   :  { %16 = vsyncpa [#allocation10], 0 }
   0x4   :  { %17 = vsyncpa [#allocation13], 0 }
   0x5   :  { %18 = vsyncpa [#allocation5], 0 }
   0x6   :  { %20 = vsyncpa [#allocation5 + $0x1], 0  ;;  %s3600_s24 = smov 0   ;;  %s3602_s25 = smov 0  }
   0x7   :  { %s3604_s26 = smov 0   ;;  %s3606_s27 = smov 0  }
   0x8   :  { %s3608_s28 = smov 0   ;;  %s3610_s29 = smov 0  }
   0x9 LB: > { %s3123_s30 = sadd.s32 4294967295, %s3547_s29   ;;  %s3124_s8 = sadd.s32 4294967294, %s3547_s29   ;;  %s3547_s29 = sphi %s3610_s29, %s26_s29   ;;  %s3543_s28 = sphi %s3608_s28, %s4442_s28   ;;  %s3539_s27 = sphi %s3606_s27, %s4441_s27   ;;  %s3535_s26 = sphi %s3604_s26, %s4440_s26   ;;  %s3531_s25 = sphi %s3602_s25, %s4439_s25   ;;  %s3527_s24 = sphi %s3600_s24, %s4438_s24  }
   0xa   : > { %s38_s9 = sadd.s32 1, %s3543_s28  ;;  %s47_s10 = sadd.s32 1, %s3535_s26 }
   0xb   : > { %p40_p0 = scmp.ge.s32.totalorder %s38_s9, 2  ;;  %p54_p1 = scmp.ne.s32.totalorder %s3535_s26, %s3531_s25 }
   0xc   : > { %p55_p2 = scmp.eq.s32.totalorder %s3547_s29, 0  ;;  %p60_p3 = scmp.ne.s32.totalorder %s3531_s25, %s3527_s24 }
   0xd   : > { %s4444_s9 = smov (%p40_p0, %s38_s9), 0  ;;  %p3645_p5 = scmp.eq.s32.totalorder %s3123_s30, 0 }
   0xe   : > { %4423 = sst [smem:[#allocation20_spill]] %s4444_s9  ;;  %p3641_p4 = por %p55_p2, %p54_p1 }
   0xf   : > { %s42_s13 = ssub.s32 %s3543_s28, %s4444_s9  ;;  %p210_p6 = scmp.eq.s32.totalorder %s3123_s30, 1 }
  0x10   : > { %p45_p7 = scmp.eq.s32.totalorder %s42_s13, 0  ;;  %p3653_p8 = por %p3645_p5, %p60_p3 }
  0x11   : > { %p3657_p9 = por %p210_p6, %p54_p1  ;;  %p216_p10 = scmp.eq.s32.totalorder %s3124_s8, 1 }
  0x12   : > { %s3662_s16 = scalar_select %p45_p7, %s3535_s26, %s47_s10  }
  0x13   : > { %s4427_s15 = scalar_select %p3657_p9, 1, 0 }
  0x14   : > { %4428 = sst [smem:[#allocation21_spill]] %s3662_s16  ;;  %p3664_p11 = por %p216_p10, %p60_p3 }
  0x15   : > { %p3125_p12 = scmp.ge.s32.totalorder %s3547_s29, 1  ;;  %p223_p13 = scmp.lt.s32.totalorder %s3547_s29, 3 }
  0x16   : > { %s4429_s17 = scalar_select %p3664_p11, 1, 0 }
  0x17   : > { %p3670_p0 = pnand %p3125_p12, %p223_p13  ;;  %s3549_s19 = smov [#allocation6]  }
  0x18   : > { %s239_s20 = sshll.u32 %s3549_s19, 4  ;;  %s3550_s21 = smov [#allocation9]   ;;  %s240_s20 = int_to_ptr.vmem [resolvable:$true] %s239_s20 }
  0x19   : > { %s261_s22 = sshll.u32 %s3550_s21, 4  ;;  %p3209_p1 = pneg %p3670_p0  ;;  %s3676_s22 = int_to_ptr.vmem [resolvable:$true] %s261_s22 }
  0x1a   : > { %s3551_s30 = smov [#allocation8]   ;;  %s3552_s10 = smov [#allocation11]  }
  0x1b   : > { %p3680_p2 = pnand %p3209_p1, %p3645_p5  ;;  %s250_s8 = sshll.u32 %s3551_s30, 4  ;;  %s3684_s8 = int_to_ptr.vmem [resolvable:$true] %s250_s8 }
  0x1c   : > { %s272_s13 = sshll.u32 %s3552_s10, 4  ;;  %s3310_s21 = scalar_lea.vmem %s240_s20, 16  ;;  %s3686_s13 = int_to_ptr.vmem [resolvable:$true] %s272_s13 }
  0x1d   : > { %p3690_p3 = pneg %p3680_p2  ;;  %p3311_p6 = scmp.ne.s32.totalorder %s240_s20, %s3310_s21 }
  0x1e   : > { %s3317_s9 = scalar_lea.vmem %s240_s20, 32  ;;  %p3318_p12 = scmp.lt.s32.totalorder %s240_s20, %s240_s20 }
  0x1f   : > { %p3313_p7 = pnand %p3311_p6, %p3690_p3  ;;  %p3319_p13 = scmp.lt.s32.totalorder %s3317_s9, %s3310_s21 }
  0x21   : > { %p3314_p10 = pneg %p3313_p7  ;;  %p3320_p1 = por %p3319_p13, %p3318_p12 }
  0x23   : > { %p3321_p11 = pnand %p3320_p1, %p3314_p10 }
  0x25   : > { %3324 = shalt.err (!%p3321_p11)
}
  0x26   : > { %3212 = dma.hbm_to_vmem [thread:$0]  (!%p3680_p2), %s4414_s2, 16, %s240_s20, [#allocation7]  }
  0x27   : > { %s3336_s16 = scalar_lea.vmem %s3676_s22, 16  ;;  %s3343_s9 = scalar_lea.vmem %s3676_s22, 32 }
  0x28   : > { %p3337_p6 = scmp.ne.s32.totalorder %s3676_s22, %s3336_s16  ;;  %p3344_p10 = scmp.lt.s32.totalorder %s3676_s22, %s3676_s22 }
  0x29   : > { %p3345_p11 = scmp.lt.s32.totalorder %s3343_s9, %s3336_s16 }
  0x2a   : > { %p3339_p7 = pnand %p3337_p6, %p3690_p3 }
  0x2b   : > { %p3346_p12 = por %p3345_p11, %p3344_p10 }
  0x2c   : > { %p3340_p9 = pneg %p3339_p7 }
  0x2e   : > { %p3347_p13 = pnand %p3346_p12, %p3340_p9 }
  0x30   : > { %3350 = shalt.err (!%p3347_p13)
}
  0x31   : > { %3218 = dma.hbm_to_vmem [thread:$0]  (!%p3680_p2), %s4416_s4, 16, %s3676_s22, [#allocation10]  }
  0x32   : > { %s3362_s20 = scalar_lea.vmem %s3684_s8, 16  ;;  %s3369_s16 = scalar_lea.vmem %s3684_s8, 32 }
  0x33   : > { %p3363_p1 = scmp.ne.s32.totalorder %s3684_s8, %s3362_s20  ;;  %p3370_p9 = scmp.lt.s32.totalorder %s3684_s8, %s3684_s8 }
  0x34   : > { %p3371_p10 = scmp.lt.s32.totalorder %s3369_s16, %s3362_s20 }
  0x35   : > { %p3365_p6 = pnand %p3363_p1, %p3690_p3 }
  0x36   : > { %p3372_p11 = por %p3371_p10, %p3370_p9 }
  0x37   : > { %p3366_p7 = pneg %p3365_p6 }
  0x39   : > { %p3373_p12 = pnand %p3372_p11, %p3366_p7 }
  0x3b   : > { %3376 = shalt.err (!%p3373_p12)
}
  0x3c   : > { %3215 = dma.hbm_to_vmem [thread:$0]  (!%p3680_p2), %s4415_s3, 16, %s3684_s8, [#allocation7]  }
  0x3d   : > { %s3388_s22 = scalar_lea.vmem %s3686_s13, 384  ;;  %p3396_p9 = scmp.lt.s32.totalorder %s3686_s13, %s3686_s13 }
  0x3e   : > { %p3389_p13 = scmp.ne.s32.totalorder %s3686_s13, %s3388_s22  ;;  %p3397_p7 = scmp.lt.s32.totalorder %s3388_s22, %s3388_s22 }
  0x40   : > { %p3391_p1 = pnand %p3389_p13, %p3690_p3  ;;  %p3398_p10 = por %p3397_p7, %p3396_p9 }
  0x42   : > { %p3392_p6 = pneg %p3391_p1 }
  0x44   : > { %p3399_p11 = pnand %p3398_p10, %p3392_p6 }
  0x46   : > { %3402 = shalt.err (!%p3399_p11)
}
  0x47   : > { %3221 = dma.hbm_to_vmem [thread:$0]  (!%p3680_p2), %s4417_s5, 384, %s3686_s13, [#allocation10]  }
  0x48   : > { %s3553_s8 = smov [#allocation12]  }
  0x49   : > { %s283_s20 = sshll.u32 %s3553_s8, 4  ;;  %s284_s20 = int_to_ptr.vmem [resolvable:$true] %s283_s20 }
  0x4a   : > { %s3414_s16 = scalar_lea.vmem %s284_s20, 48  ;;  %s3421_s10 = scalar_lea.vmem %s284_s20, 64 }
  0x4b   : > { %p3415_p12 = scmp.ne.s32.totalorder %s284_s20, %s3414_s16  ;;  %p3422_p9 = scmp.lt.s32.totalorder %s284_s20, %s284_s20 }
  0x4c   : > { %p3423_p6 = scmp.lt.s32.totalorder %s3421_s10, %s3414_s16 }
  0x4d   : > { %p3417_p13 = pnand %p3415_p12, %p3690_p3 }
  0x4e   : > { %p3424_p7 = por %p3423_p6, %p3422_p9 }
  0x4f   : > { %p3418_p1 = pneg %p3417_p13 }
  0x51   : > { %p3425_p10 = pnand %p3424_p7, %p3418_p1 }
  0x53   : > { %3428 = shalt.err (!%p3425_p10)
}
  0x54   : > { %3224 = dma.hbm_to_vmem [thread:$0]  (!%p3680_p2), %s4418_s6, 48, %s284_s20, [#allocation13]  }
  0x55   : > { %p4422_p11 = scmp.ge.s32.totalorder %s3547_s29, 2 }
  0x57   : > { %290 = sbr.rel (%p4422_p11) target bundleno = 126 (0x7e), region = 40 }
  0x5c   : > { %293 = sbr.rel (!%p3641_p4) target bundleno = 126 (0x7e), region = 44  ;;  %s294_s13 = sand.u32 (%p3641_p4), 1, %s3535_s26  }
  0x5d   : > { %s3132_s19 = sshll.u32 (%p3641_p4), %s3543_s28, 3  ;;  %s3181_s21 = smul.u32 (%p3641_p4), 2816, %s294_s13 }
  0x5e   : > { %s301_s30 = ssub.s32 (%p3641_p4), 12, %s3132_s19  ;;  %s3756_s20 = scalar_lea.sflag (%p3641_p4), [#allocation4], %s294_s13 }
  0x5f   : > { %p302_p3 = scmp.lt.s32.totalorder (%p3641_p4), %s301_s30, 8  ;;  %s298_s16 = scalar_lea.vmem (%p3641_p4), [#allocation3], %s3181_s21 }
  0x61   : > { %s4446_s30 = smov (!%p302_p3, %s301_s30), 8 }
  0x62   : > { %s3753_s23 = smul.u32 5632, %s4446_s30 }
  0x64   : > { %s308_s8 = ssub.s32 45056, %s3753_s23 }
  0x65   : > { %309 = vsyncadd %s3756_s20, %s308_s8  ;;  %p3136_p4 = scmp.ne.s32.totalorder %s3753_s23, 0  ;;  %s3182_s11 = smul.u32 45056, %s3543_s28 }
  0x66   : > { %s317_s10 = sshll.u32 %s298_s16, 4  ;;  %s3433_s8 = scalar_lea.hbm %s4412_s0, 67584  ;;  %s3766_s10 = int_to_ptr.vmem [resolvable:$true] %s317_s10 }
  0x67   : > { %s3764_s19 = scalar_lea.hbm %s4412_s0, %s3182_s11 }
  0x68   : > { %s3429_s13 = scalar_lea.hbm %s3764_s19, %s3753_s23 }
  0x69   : > { %p3430_p2 = scmp.ne.s32.totalorder %s3764_s19, %s3429_s13  ;;  %p3435_p1 = scmp.lt.s32.totalorder %s3433_s8, %s3429_s13 }
  0x6b   : > { %p3431_p12 = pnand %p3430_p2, %p3136_p4 }
  0x6d   : > { %p3432_p13 = pneg %p3431_p12 }
  0x6f   : > { %p3437_p9 = pnand %p3435_p1, %p3432_p13 }
  0x71   : > { %3440 = shalt.err (!%p3437_p9)
}
  0x72   : > { %s3441_s16 = scalar_lea.vmem %s3766_s10, %s3753_s23  ;;  %s3554_s11 = smov [#allocation3]  }
  0x73   : > { %p3442_p6 = scmp.ne.s32.totalorder %s3766_s10, %s3441_s16  ;;  %s3445_s9 = sshll.u32 %s3554_s11, 4  ;;  %s3446_s9 = int_to_ptr.vmem [resolvable:$false] %s3445_s9 }
  0x74   : > { %s3447_s22 = scalar_lea.vmem %s3446_s9, 90112  ;;  %p3448_p3 = scmp.lt.s32.totalorder %s3766_s10, %s3446_s9 }
  0x75   : > { %p3443_p7 = pnand %p3442_p6, %p3136_p4  ;;  %p3449_p2 = scmp.lt.s32.totalorder %s3447_s22, %s3441_s16 }
  0x77   : > { %p3444_p10 = pneg %p3443_p7  ;;  %p3450_p12 = por %p3449_p2, %p3448_p3 }
  0x79   : > { %p3451_p11 = pnand %p3450_p12, %p3444_p10 }
  0x7b   : > { %3454 = shalt.err (!%p3451_p11)
}
  0x7c   : > { %s3555_s13 = smov 1408   ;;  %s3556_s21 = smov 88  }
  0x7d   : > { %323 = dma.hbm_to_vmem [thread:$0]  (%p3136_p4), %s3764_s19, %s3753_s23, %s3766_s10, %s3756_s20, %s3555_s13, %s3555_s13, %s3556_s21  }
  0x7e PF: > { %329 = sbr.rel (%p3670_p0) target bundleno = 1132 (0x46c), region = 48  ;;  %s3791_s30 = sand.u32 (!%p3670_p0), 1, %s3531_s25  }
  0x7f   : > { %s3183_s8 = smul.u32 (!%p3670_p0), 2816, %s3791_s30  ;;  %s332_s16 = scalar_lea.sflag (!%p3670_p0), [#allocation4], %s3791_s30 }
  0x81   : > { %s3795_s11 = scalar_lea.vmem (!%p3670_p0), [#allocation3], %s3183_s8 }
  0x83   : > { %3506 = dma.done.wait (%p3653_p8), %s332_s16, 45056  }
  0x84   : > { %3508 = vsyncadd (%p3653_p8), %s332_s16, 4294922240 }
  0x85   : > { %3510 = dma.done.wait (%p3645_p5), [#allocation7], 32  }
  0x86   : > { %3512 = vsyncadd (%p3645_p5), [#allocation7], 4294967264 }
  0x87   : > { %3514 = dma.done.wait (%p3645_p5), [#allocation10], 400  }
  0x88   : > { %3516 = vsyncadd (%p3645_p5), [#allocation10], 4294966896 }
  0x89   : > { %3518 = dma.done.wait (%p3645_p5), [#allocation13], 48  }
  0x8a   : > { %3520 = vsyncadd (%p3645_p5), [#allocation13], 4294967248  ;;  %v1249_v0 = vld [vmem:[%s3795_s11 + $0x160] sm:$0xff]  ;;  %v1250_v1 = vld [vmem:[%s3795_s11 + $0x168] sm:$0xff]  ;;  %v1557_v3 = vlaneseq  ;;  %vm3558_vm1 = vmmov 0   ;;  %vm2541_vm2 = vcmask 130112  }
  0x8b   : > { %v1251_v2 = vld [vmem:[%s3795_s11 + $0x170] sm:$0xff]  ;;  %v1949_v4 = vadd.f32 %v1250_v1, %v1249_v0  ;;  %v1252_v5 = vld [vmem:[%s3795_s11 + $0x178] sm:$0xff]  ;;  %v1205_v7 = vld [vmem:[%s3795_s11] sm:$0xff]  ;;  %vm2548_vm3 = vcmask 195712   ;;  %vm2555_vm4 = vcmask 261312   ;;  %vm2690_vm5 = vcmask 1041409  }
  0x8c   : > { %v1253_v8 = vld [vmem:[%s3795_s11 + $0x180] sm:$0xff]  ;;  %v1206_v9 = vld [vmem:[%s3795_s11 + $0x8] sm:$0xff]  ;;  %v1207_v10 = vld [vmem:[%s3795_s11 + $0x10] sm:$0xff]  ;;  %v3822_v11 = vand.u32 127, %v1557_v3  ;;  %vm2692_vm6 = vcmask 1042434   ;;  %vm2694_vm7 = vcmask 1043459  }
  0x8d   : > { %v1981_v6 = vadd.f32 %v1949_v4, %v1251_v2  ;;  %v1945_v13 = vadd.f32 %v1206_v9, %v1205_v7  ;;  %v1254_v14 = vld [vmem:[%s3795_s11 + $0x188] sm:$0xff]  ;;  %v1208_v15 = vld [vmem:[%s3795_s11 + $0x18] sm:$0xff]  ;;  %v1261_v19 = vld [vmem:[%s3795_s11 + $0x1c0] sm:$0xff]  ;;  %vm2696_vm8 = vcmask 1044484   ;;  %vm2698_vm9 = vcmask 1045509   ;;  %s3184_s22 = smul.u32 24, %s3791_s30 }
  0x8e   : > { %v1260_v18 = vld [vmem:[%s3795_s11 + $0x1b8] sm:$0xff]  ;;  %v1255_v20 = vld [vmem:[%s3795_s11 + $0x190] sm:$0xff]  ;;  %v1209_v21 = vld [vmem:[%s3795_s11 + $0x20] sm:$0xff]  ;;  %v3832_v24 = vadd.s32 1280, %v3822_v11  ;;  %vm2700_vm10 = vcmask 1046534   ;;  %vm2702_vm11 = vcmask 1047559  }
  0x8f   : > { %v2013_v12 = vadd.f32 %v1981_v6, %v1252_v5  ;;  %v1977_v17 = vadd.f32 %v1945_v13, %v1207_v10  ;;  %v1262_v22 = vld [vmem:[%s3795_s11 + $0x1c8] sm:$0xff]  ;;  %v1950_v23 = vadd.f32 %v1261_v19, %v1260_v18  ;;  %v1263_v27 = vld [vmem:[%s3795_s11 + $0x1d0] sm:$0xff]  ;;  %v1256_v28 = vld [vmem:[%s3795_s11 + $0x198] sm:$0xff]  ;;  %vm2704_vm12 = vcmask 261120   ;;  %s3185_s13 = smul.u32 384, %s3539_s27  ;;  %s385_s21 = scalar_lea.vmem [#allocation14], %s3184_s22 }
  0x90   : > { %v1210_v29 = vld [vmem:[%s3795_s11 + $0x28] sm:$0xff]  ;;  %v1264_v30 = vld [vmem:[%s3795_s11 + $0x1d8] sm:$0xff]  ;;  %v1217_v35 = vld [vmem:[%s3795_s11 + $0x60] sm:$0xff]  ;;  %vm1592_vm0 = vcmp.lt.s32.totalorder %v3832_v24, 1296  ;;  %vm2778_vm13 = vcmask 64512   ;;  %s2994_s8 = sshll.u32 %s385_s21, 4  ;;  %s2995_s8 = int_to_ptr.vmem [resolvable:$true] %s2994_s8 }
  0x91   : > { %v2045_v16 = vadd.f32 %v2013_v12, %v1253_v8  ;;  %v2009_v26 = vadd.f32 %v1977_v17, %v1208_v15  ;;  %v1982_v31 = vadd.f32 %v1950_v23, %v1262_v22  ;;  %v1216_v34 = vld [vmem:[%s3795_s11 + $0x58] sm:$0xff]  ;;  %v1218_v36 = vld [vmem:[%s3795_s11 + $0x68] sm:$0xff]  ;;  %v1257_v37 = vld [vmem:[%s3795_s11 + $0x1a0] sm:$0xff]  ;;  %s2992_s12 = scalar_lea.hbm %s4419_s7, %s3185_s13  ;;  %s2980_s14 = scalar_lea.sflag [#allocation5], %s3791_s30 }
  0x92   : > { %v1258_v38 = vld [vmem:[%s3795_s11 + $0x1a8] sm:$0xff]  ;;  %v1211_v39 = vld [vmem:[%s3795_s11 + $0x30] sm:$0xff]  ;;  %v1946_v41 = vadd.f32 %v1217_v35, %v1216_v34  ;;  %v1265_v45 = vld [vmem:[%s3795_s11 + $0x1e0] sm:$0xff]  ;;  %s3455_s18 = scalar_lea.vmem %s2995_s8, 384  ;;  %p4433_p8 = scmp.ne.s32.totalorder %s4427_s15, 0 }
  0x93   : > { %v2077_v25 = vadd.f32 %v2045_v16, %v1254_v14  ;;  %v2041_v33 = vadd.f32 %v2009_v26, %v1209_v21  ;;  %v2014_v40 = vadd.f32 %v1982_v31, %v1263_v27  ;;  %v1259_v42 = vld [vmem:[%s3795_s11 + $0x1b0] sm:$0xff]  ;;  %v1212_v47 = vld [vmem:[%s3795_s11 + $0x38] sm:$0xff]  ;;  %v1266_v48 = vld [vmem:[%s3795_s11 + $0x1e8] sm:$0xff]  ;;  %p3456_p5 = scmp.ne.s32.totalorder %s2995_s8, %s3455_s18  ;;  %s3559_s27 = smov [#allocation14]  }
  0x94   : > { %v1219_v46 = vld [vmem:[%s3795_s11 + $0x70] sm:$0xff]  ;;  %v1978_v50 = vadd.f32 %v1946_v41, %v1218_v36  ;;  %v1220_v54 = vld [vmem:[%s3795_s11 + $0x78] sm:$0xff]  ;;  %v1273_v56 = vld [vmem:[%s3795_s11 + $0x220] sm:$0xff]  ;;  %v1647_v57 = vsel %vm1592_vm0, %v1259_v42, 0.0  ;;  %s3459_s23 = sshll.u32 %s3559_s27, 4  ;;  %s3460_s23 = int_to_ptr.vmem [resolvable:$false] %s3459_s23 }
  0x95   : > { %v2109_v32 = vadd.f32 %v2077_v25, %v1255_v20  ;;  %v2073_v44 = vadd.f32 %v2041_v33, %v1210_v29  ;;  %v2046_v49 = vadd.f32 %v2014_v40, %v1264_v30  ;;  %v1271_v51 = vld [vmem:[%s3795_s11 + $0x210] sm:$0xff]  ;;  %v1272_v55 = vld [vmem:[%s3795_s11 + $0x218] sm:$0xff]  ;;  %v1213_v58 = vld [vmem:[%s3795_s11 + $0x40] sm:$0xff]  ;;  %p3457_p0 = pnand %p3456_p5, %p4433_p8  ;;  %s3461_s20 = scalar_lea.vmem %s3460_s23, 768 }
  0x96   : > { %v1214_v59 = vld [vmem:[%s3795_s11 + $0x48] sm:$0xff]  ;;  %v1215_v60 = vld [vmem:[%s3795_s11 + $0x50] sm:$0xff]  ;;  %v2010_v62 = vadd.f32 %v1978_v50, %v1219_v46  ;;  %v1951_v63 = vadd.f32 %v1272_v55, %v1271_v51  ;;  %v1221_v4 = vld [vmem:[%s3795_s11 + $0x80] sm:$0xff]  ;;  %p3462_p4 = scmp.lt.s32.totalorder %s2995_s8, %s3460_s23  ;;  %p3463_p13 = scmp.lt.s32.totalorder %s3461_s20, %s3455_s18 }
  0x97   : > { %v2141_v43 = vadd.f32 %v2109_v32, %v1256_v28  ;;  %v2105_v53 = vadd.f32 %v2073_v44, %v1211_v39  ;;  %v2078_v61 = vadd.f32 %v2046_v49, %v1265_v45  ;;  %v1267_v2 = vld [vmem:[%s3795_s11 + $0x1f0] sm:$0xff]  ;;  %v1274_v5 = vld [vmem:[%s3795_s11 + $0x228] sm:$0xff]  ;;  %v1268_v6 = vld [vmem:[%s3795_s11 + $0x1f8] sm:$0xff]  ;;  %v1603_v19 = vsel %vm1592_vm0, %v1215_v60, 0.0  ;;  %p3458_p11 = pneg %p3457_p0 }
  0x98   : > { %v2042_v8 = vadd.f32 %v2010_v62, %v1220_v54  ;;  %v1983_v9 = vadd.f32 %v1951_v63, %v1273_v56  ;;  %v1227_v10 = vld [vmem:[%s3795_s11 + $0xb0] sm:$0xff]  ;;  %v1228_v12 = vld [vmem:[%s3795_s11 + $0xb8] sm:$0xff]  ;;  %v1222_v15 = vld [vmem:[%s3795_s11 + $0x88] sm:$0xff]  ;;  %p3464_p1 = por %p3463_p13, %p3462_p4 }
  0x99   : > { %v2173_v52 = vadd.f32 %v2141_v43, %v1257_v37  ;;  %v2137_v1 = vadd.f32 %v2105_v53, %v1212_v47  ;;  %v2110_v7 = vadd.f32 %v2078_v61, %v1266_v48  ;;  %v1275_v16 = vld [vmem:[%s3795_s11 + $0x230] sm:$0xff]  ;;  %v1229_v17 = vld [vmem:[%s3795_s11 + $0xc0] sm:$0xff]  ;;  %v1947_v18 = vadd.f32 %v1228_v12, %v1227_v10  ;;  %v1270_v21 = vld [vmem:[%s3795_s11 + $0x208] sm:$0xff] }
  0x9a   : > { %v1269_v20 = vld [vmem:[%s3795_s11 + $0x200] sm:$0xff]  ;;  %v2074_v23 = vadd.f32 %v2042_v8, %v1221_v4  ;;  %v2015_v25 = vadd.f32 %v1983_v9, %v1274_v5  ;;  %v1230_v26 = vld [vmem:[%s3795_s11 + $0xc8] sm:$0xff]  ;;  %v1223_v28 = vld [vmem:[%s3795_s11 + $0x90] sm:$0xff]  ;;  %v1658_v39 = vsel %vm1592_vm0, %v1270_v21, 0.0  ;;  %p3465_p9 = pnand %p3464_p1, %p3458_p11 }
  0x9b   : > { %v2205_v0 = vadd.f32 %v2173_v52, %v1258_v38  ;;  %v2169_v14 = vadd.f32 %v2137_v1, %v1213_v58  ;;  %v2142_v22 = vadd.f32 %v2110_v7, %v1267_v2  ;;  %v1276_v29 = vld [vmem:[%s3795_s11 + $0x238] sm:$0xff]  ;;  %v1231_v30 = vld [vmem:[%s3795_s11 + $0xd0] sm:$0xff]  ;;  %v1979_v31 = vadd.f32 %v1947_v18, %v1229_v17  ;;  %v1305_v36 = vld [vmem:[%s3795_s11 + $0x320] sm:$0xff] }
  0x9c   : > { %v2106_v33 = vadd.f32 %v2074_v23, %v1222_v15  ;;  %v2047_v34 = vadd.f32 %v2015_v25, %v1275_v16  ;;  %v1304_v35 = vld [vmem:[%s3795_s11 + $0x318] sm:$0xff]  ;;  %v1306_v37 = vld [vmem:[%s3795_s11 + $0x328] sm:$0xff]  ;;  %v1225_v41 = vld [vmem:[%s3795_s11 + $0xa0] sm:$0xff] }
  0x9d   : > { %v2237_v13 = vadd.f32 %v2205_v0, %v1647_v57  ;;  %v2201_v27 = vadd.f32 %v2169_v14, %v1214_v59  ;;  %v2174_v32 = vadd.f32 %v2142_v22, %v1268_v6  ;;  %v1224_v40 = vld [vmem:[%s3795_s11 + $0x98] sm:$0xff]  ;;  %v1277_v42 = vld [vmem:[%s3795_s11 + $0x240] sm:$0xff]  ;;  %v2011_v43 = vadd.f32 %v1979_v31, %v1230_v26  ;;  %v1226_v46 = vld [vmem:[%s3795_s11 + $0xa8] sm:$0xff] }
  0x9e   : > { %v1954_v44 = vadd.f32 %v1305_v36, %v1304_v35  ;;  %v2138_v47 = vadd.f32 %v2106_v33, %v1223_v28  ;;  %v2079_v48 = vadd.f32 %v2047_v34, %v1276_v29  ;;  %v1232_v49 = vld [vmem:[%s3795_s11 + $0xd8] sm:$0xff]  ;;  %v1307_v50 = vld [vmem:[%s3795_s11 + $0x330] sm:$0xff]  ;;  %v1278_v51 = vld [vmem:[%s3795_s11 + $0x248] sm:$0xff]  ;;  %v1614_v62 = vsel %vm1592_vm0, %v1226_v46, 0.0 }
  0x9f   : > { %2401 = vadd.xlane.f32.xlu1 %v2237_v13  ;;  %v2233_v38 = vadd.f32 %v2201_v27, %v1603_v19  ;;  %v2206_v45 = vadd.f32 %v2174_v32, %v1269_v20  ;;  %v1233_v52 = vld [vmem:[%s3795_s11 + $0xe0] sm:$0xff]  ;;  %v2043_v53 = vadd.f32 %v2011_v43, %v1231_v30  ;;  %v1308_v59 = vld [vmem:[%s3795_s11 + $0x338] sm:$0xff]  ;;  %v1294_v60 = vld [vmem:[%s3795_s11 + $0x2c8] sm:$0xff] }
  0xa0   : > { %v1986_v54 = vadd.f32 %v1954_v44, %v1306_v37  ;;  %v1293_v55 = vld [vmem:[%s3795_s11 + $0x2c0] sm:$0xff]  ;;  %v2170_v57 = vadd.f32 %v2138_v47, %v1224_v40  ;;  %v2111_v58 = vadd.f32 %v2079_v48, %v1277_v42  ;;  %v1295_v61 = vld [vmem:[%s3795_s11 + $0x2d0] sm:$0xff]  ;;  %v1280_v0 = vld [vmem:[%s3795_s11 + $0x258] sm:$0xff] }
  0xa1   : > { %2393 = vadd.xlane.f32.xlu0 %v2233_v38  ;;  %v2238_v56 = vadd.f32 %v2206_v45, %v1658_v39  ;;  %v1279_v63 = vld [vmem:[%s3795_s11 + $0x250] sm:$0xff]  ;;  %v1281_v1 = vld [vmem:[%s3795_s11 + $0x260] sm:$0xff]  ;;  %v2075_v2 = vadd.f32 %v2043_v53, %v1232_v49  ;;  %v1953_v5 = vadd.f32 %v1294_v60, %v1293_v55  ;;  %v1234_v8 = vld [vmem:[%s3795_s11 + $0xe8] sm:$0xff] }
  0xa2   : > { %v2018_v4 = vadd.f32 %v1986_v54, %v1307_v50  ;;  %v2202_v6 = vadd.f32 %v2170_v57, %v1225_v41  ;;  %v2143_v7 = vadd.f32 %v2111_v58, %v1278_v51  ;;  %v1309_v9 = vld [vmem:[%s3795_s11 + $0x340] sm:$0xff]  ;;  %v1296_v10 = vld [vmem:[%s3795_s11 + $0x2d8] sm:$0xff]  ;;  %v1235_v12 = vld [vmem:[%s3795_s11 + $0xf0] sm:$0xff]  ;;  %v1669_v25 = vsel %vm1592_vm0, %v1281_v1, 0.0 }
  0xa3   : > { %2403 = vadd.xlane.f32.xlu1 %v2238_v56  ;;  %v2107_v13 = vadd.f32 %v2075_v2, %v1233_v52  ;;  %v1985_v15 = vadd.f32 %v1953_v5, %v1295_v61  ;;  %v1282_v16 = vld [vmem:[%s3795_s11 + $0x268] sm:$0xff]  ;;  %v1283_v17 = vld [vmem:[%s3795_s11 + $0x270] sm:$0xff]  ;;  %v1297_v21 = vld [vmem:[%s3795_s11 + $0x2e0] sm:$0xff] }
  0xa4   : > { %v2050_v14 = vadd.f32 %v2018_v4, %v1308_v59  ;;  %v2234_v18 = vadd.f32 %v2202_v6, %v1614_v62  ;;  %v2175_v19 = vadd.f32 %v2143_v7, %v1279_v63  ;;  %v1310_v20 = vld [vmem:[%s3795_s11 + $0x348] sm:$0xff]  ;;  %v1284_v22 = vld [vmem:[%s3795_s11 + $0x278] sm:$0xff]  ;;  %v1952_v23 = vadd.f32 %v1283_v17, %v1282_v16  ;;  %v1237_v27 = vld [vmem:[%s3795_s11 + $0x100] sm:$0xff] }
  0xa5   : > { %v1236_v26 = vld [vmem:[%s3795_s11 + $0xf8] sm:$0xff]  ;;  %v2139_v28 = vadd.f32 %v2107_v13, %v1234_v8  ;;  %v2017_v30 = vadd.f32 %v1985_v15, %v1296_v10  ;;  %v1285_v31 = vld [vmem:[%s3795_s11 + $0x280] sm:$0xff]  ;;  %v1311_v33 = vld [vmem:[%s3795_s11 + $0x350] sm:$0xff]  ;;  %v1625_v44 = vsel %vm1592_vm0, %v1237_v27, 0.0 }
  0xa6   : > { %v2082_v29 = vadd.f32 %v2050_v14, %v1309_v9  ;;  %2395 = vadd.xlane.f32.xlu0 %v2234_v18  ;;  %v2207_v32 = vadd.f32 %v2175_v19, %v1280_v0  ;;  %v1298_v34 = vld [vmem:[%s3795_s11 + $0x2e8] sm:$0xff]  ;;  %v1984_v36 = vadd.f32 %v1952_v23, %v1284_v22  ;;  %v1239_v41 = vld [vmem:[%s3795_s11 + $0x110] sm:$0xff]  ;;  %v1240_v42 = vld [vmem:[%s3795_s11 + $0x118] sm:$0xff] }
  0xa7   : > { %v1286_v35 = vld [vmem:[%s3795_s11 + $0x288] sm:$0xff]  ;;  %v2171_v37 = vadd.f32 %v2139_v28, %v1235_v12  ;;  %v2049_v39 = vadd.f32 %v2017_v30, %v1297_v21  ;;  %v1312_v45 = vld [vmem:[%s3795_s11 + $0x358] sm:$0xff]  ;;  %v1313_v46 = vld [vmem:[%s3795_s11 + $0x360] sm:$0xff] }
  0xa8   : > { %v2114_v38 = vadd.f32 %v2082_v29, %v1310_v20  ;;  %v1238_v40 = vld [vmem:[%s3795_s11 + $0x108] sm:$0xff]  ;;  %v2239_v43 = vadd.f32 %v2207_v32, %v1669_v25  ;;  %v1299_v47 = vld [vmem:[%s3795_s11 + $0x2f0] sm:$0xff]  ;;  %v2016_v48 = vadd.f32 %v1984_v36, %v1285_v31  ;;  %v1241_v55 = vld [vmem:[%s3795_s11 + $0x120] sm:$0xff] }
  0xa9   : > { %v1948_v49 = vadd.f32 %v1239_v41, %v1238_v40  ;;  %v2203_v50 = vadd.f32 %v2171_v37, %v1236_v26  ;;  %v1314_v51 = vld [vmem:[%s3795_s11 + $0x368] sm:$0xff]  ;;  %v2081_v53 = vadd.f32 %v2049_v39, %v1298_v34  ;;  %v1287_v54 = vld [vmem:[%s3795_s11 + $0x290] sm:$0xff]  ;;  %v1300_v56 = vld [vmem:[%s3795_s11 + $0x2f8] sm:$0xff] }
  0xaa   : > { %v2146_v52 = vadd.f32 %v2114_v38, %v1311_v33  ;;  %2405 = vadd.xlane.f32.xlu1 %v2239_v43  ;;  %v1288_v57 = vld [vmem:[%s3795_s11 + $0x298] sm:$0xff]  ;;  %v2048_v58 = vadd.f32 %v2016_v48, %v1286_v35  ;;  %v1337_v60 = vld [vmem:[%s3795_s11 + $0x420] sm:$0xff]  ;;  %v1242_v0 = vld [vmem:[%s3795_s11 + $0x128] sm:$0xff]  ;;  %v1702_v4 = vsel %vm1592_vm0, %v1314_v51, 0.0 }
  0xab   : > { %v1980_v59 = vadd.f32 %v1948_v49, %v1240_v42  ;;  %v2235_v61 = vadd.f32 %v2203_v50, %v1625_v44  ;;  %v2113_v63 = vadd.f32 %v2081_v53, %v1299_v47  ;;  %v1338_v1 = vld [vmem:[%s3795_s11 + $0x428] sm:$0xff]  ;;  %v1339_v2 = vld [vmem:[%s3795_s11 + $0x430] sm:$0xff]  ;;  %v1301_v5 = vld [vmem:[%s3795_s11 + $0x300] sm:$0xff] }
  0xac   : > { %v2178_v62 = vadd.f32 %v2146_v52, %v1312_v45  ;;  %v1302_v6 = vld [vmem:[%s3795_s11 + $0x308] sm:$0xff]  ;;  %v1303_v7 = vld [vmem:[%s3795_s11 + $0x310] sm:$0xff]  ;;  %v2080_v8 = vadd.f32 %v2048_v58, %v1287_v54  ;;  %v1957_v10 = vadd.f32 %v1338_v1, %v1337_v60  ;;  %v1289_v14 = vld [vmem:[%s3795_s11 + $0x2a0] sm:$0xff] }
  0xad   : > { %v2012_v9 = vadd.f32 %v1980_v59, %v1241_v55  ;;  %2397 = vadd.xlane.f32.xlu0 %v2235_v61  ;;  %v2145_v13 = vadd.f32 %v2113_v63, %v1300_v56  ;;  %v1243_v15 = vld [vmem:[%s3795_s11 + $0x130] sm:$0xff]  ;;  %v1340_v16 = vld [vmem:[%s3795_s11 + $0x438] sm:$0xff]  ;;  %v1290_v17 = vld [vmem:[%s3795_s11 + $0x2a8] sm:$0xff]  ;;  %v1691_v30 = vsel %vm1592_vm0, %v1303_v7, 0.0 }
  0xae   : > { %v2210_v12 = vadd.f32 %v2178_v62, %v1313_v46  ;;  %v2112_v18 = vadd.f32 %v2080_v8, %v1288_v57  ;;  %v1989_v20 = vadd.f32 %v1957_v10, %v1339_v2  ;;  %v1315_v21 = vld [vmem:[%s3795_s11 + $0x370] sm:$0xff]  ;;  %v1316_v22 = vld [vmem:[%s3795_s11 + $0x378] sm:$0xff]  ;;  %v1341_v27 = vld [vmem:[%s3795_s11 + $0x440] sm:$0xff] }
  0xaf   : > { %v2044_v19 = vadd.f32 %v2012_v9, %v1242_v0  ;;  %v2177_v25 = vadd.f32 %v2145_v13, %v1301_v5  ;;  %v1244_v26 = vld [vmem:[%s3795_s11 + $0x138] sm:$0xff]  ;;  %v1317_v28 = vld [vmem:[%s3795_s11 + $0x380] sm:$0xff]  ;;  %v1955_v29 = vadd.f32 %v1316_v22, %v1315_v21  ;;  %v1291_v31 = vld [vmem:[%s3795_s11 + $0x2b0] sm:$0xff] }
  0xb0   : > { %v2242_v23 = vadd.f32 %v2210_v12, %v1702_v4  ;;  %v1292_v32 = vld [vmem:[%s3795_s11 + $0x2b8] sm:$0xff]  ;;  %v2144_v33 = vadd.f32 %v2112_v18, %v1289_v14  ;;  %v2021_v35 = vadd.f32 %v1989_v20, %v1340_v16  ;;  %v1318_v36 = vld [vmem:[%s3795_s11 + $0x388] sm:$0xff]  ;;  %v1245_v38 = vld [vmem:[%s3795_s11 + $0x140] sm:$0xff] }
  0xb1   : > { %v2076_v34 = vadd.f32 %v2044_v19, %v1243_v15  ;;  %v2209_v37 = vadd.f32 %v2177_v25, %v1302_v6  ;;  %v1342_v39 = vld [vmem:[%s3795_s11 + $0x448] sm:$0xff]  ;;  %v1319_v40 = vld [vmem:[%s3795_s11 + $0x390] sm:$0xff]  ;;  %v1987_v41 = vadd.f32 %v1955_v29, %v1317_v28  ;;  %v1328_v47 = vld [vmem:[%s3795_s11 + $0x3d8] sm:$0xff]  ;;  %v1680_v49 = vsel %vm1592_vm0, %v1292_v32, 0.0 }
  0xb2   : > { %2411 = vadd.xlane.f32.xlu1 %v2242_v23  ;;  %v2176_v42 = vadd.f32 %v2144_v33, %v1290_v17  ;;  %v2053_v44 = vadd.f32 %v2021_v35, %v1341_v27  ;;  %v1326_v45 = vld [vmem:[%s3795_s11 + $0x3c8] sm:$0xff]  ;;  %v1327_v46 = vld [vmem:[%s3795_s11 + $0x3d0] sm:$0xff]  ;;  %v1248_v56 = vld [vmem:[%s3795_s11 + $0x158] sm:$0xff] }
  0xb3   : > { %v2108_v43 = vadd.f32 %v2076_v34, %v1244_v26  ;;  %v2241_v48 = vadd.f32 %v2209_v37, %v1691_v30  ;;  %v1246_v50 = vld [vmem:[%s3795_s11 + $0x148] sm:$0xff]  ;;  %v1247_v51 = vld [vmem:[%s3795_s11 + $0x150] sm:$0xff]  ;;  %v2019_v53 = vadd.f32 %v1987_v41, %v1318_v36  ;;  %v1956_v54 = vadd.f32 %v1327_v46, %v1326_v45  ;;  %v1320_v59 = vld [vmem:[%s3795_s11 + $0x398] sm:$0xff] }
  0xb4   : > { %v1343_v52 = vld [vmem:[%s3795_s11 + $0x450] sm:$0xff]  ;;  %v2208_v55 = vadd.f32 %v2176_v42, %v1291_v31  ;;  %v2085_v58 = vadd.f32 %v2053_v44, %v1342_v39  ;;  %v1329_v60 = vld [vmem:[%s3795_s11 + $0x3e0] sm:$0xff]  ;;  %v1344_v61 = vld [vmem:[%s3795_s11 + $0x458] sm:$0xff]  ;;  %v1636_v9 = vsel %vm1592_vm0, %v1248_v56, 0.0 }
  0xb5   : > { %v2140_v57 = vadd.f32 %v2108_v43, %v1245_v38  ;;  %2409 = vadd.xlane.f32.xlu0 %v2241_v48  ;;  %v1321_v62 = vld [vmem:[%s3795_s11 + $0x3a0] sm:$0xff]  ;;  %v2051_v63 = vadd.f32 %v2019_v53, %v1319_v40  ;;  %v1988_v0 = vadd.f32 %v1956_v54, %v1328_v47  ;;  %v1348_v1 = vld [vmem:[%s3795_s11 + $0x478] sm:$0xff]  ;;  %v1330_v6 = vld [vmem:[%s3795_s11 + $0x3e8] sm:$0xff] }
  0xb6   : > { %v2240_v2 = vadd.f32 %v2208_v55, %v1680_v49  ;;  %v2117_v5 = vadd.f32 %v2085_v58, %v1343_v52  ;;  %v1349_v7 = vld [vmem:[%s3795_s11 + $0x480] sm:$0xff]  ;;  %v1350_v8 = vld [vmem:[%s3795_s11 + $0x488] sm:$0xff]  ;;  %v1347_v13 = vld [vmem:[%s3795_s11 + $0x470] sm:$0xff] }
  0xb7   : > { %v2172_v4 = vadd.f32 %v2140_v57, %v1246_v50  ;;  %v1345_v10 = vld [vmem:[%s3795_s11 + $0x460] sm:$0xff]  ;;  %v1346_v12 = vld [vmem:[%s3795_s11 + $0x468] sm:$0xff]  ;;  %v2083_v14 = vadd.f32 %v2051_v63, %v1320_v59  ;;  %v2020_v15 = vadd.f32 %v1988_v0, %v1329_v60  ;;  %v1958_v16 = vadd.f32 %v1349_v7, %v1348_v1  ;;  %v1331_v20 = vld [vmem:[%s3795_s11 + $0x3f0] sm:$0xff] }
  0xb8   : > { %2407 = vadd.xlane.f32.xlu1 %v2240_v2  ;;  %v2149_v18 = vadd.f32 %v2117_v5, %v1344_v61  ;;  %v1322_v19 = vld [vmem:[%s3795_s11 + $0x3a8] sm:$0xff]  ;;  %v1351_v21 = vld [vmem:[%s3795_s11 + $0x490] sm:$0xff]  ;;  %v1381_v27 = vld [vmem:[%s3795_s11 + $0x580] sm:$0xff]  ;;  %v1735_v35 = vsel %vm1592_vm0, %v1347_v13, 0.0 }
  0xb9   : > { %v2204_v17 = vadd.f32 %v2172_v4, %v1247_v51  ;;  %v1323_v22 = vld [vmem:[%s3795_s11 + $0x3b0] sm:$0xff]  ;;  %v2115_v23 = vadd.f32 %v2083_v14, %v1321_v62  ;;  %v2052_v25 = vadd.f32 %v2020_v15, %v1330_v6  ;;  %v1990_v26 = vadd.f32 %v1958_v16, %v1350_v8  ;;  %v1382_v28 = vld [vmem:[%s3795_s11 + $0x588] sm:$0xff]  ;;  %v1332_v31 = vld [vmem:[%s3795_s11 + $0x3f8] sm:$0xff] }
  0xba   : > { %v2181_v30 = vadd.f32 %v2149_v18, %v1345_v10  ;;  %v1352_v32 = vld [vmem:[%s3795_s11 + $0x498] sm:$0xff]  ;;  %v1383_v33 = vld [vmem:[%s3795_s11 + $0x590] sm:$0xff]  ;;  %v1961_v34 = vadd.f32 %v1382_v28, %v1381_v27  ;;  %v1325_v37 = vld [vmem:[%s3795_s11 + $0x3c0] sm:$0xff] }
  0xbb   : > { %v2236_v29 = vadd.f32 %v2204_v17, %v1636_v9  ;;  %v1324_v36 = vld [vmem:[%s3795_s11 + $0x3b8] sm:$0xff]  ;;  %v2147_v38 = vadd.f32 %v2115_v23, %v1322_v19  ;;  %v2084_v39 = vadd.f32 %v2052_v25, %v1331_v20  ;;  %v2022_v40 = vadd.f32 %v1990_v26, %v1351_v21  ;;  %v1333_v43 = vld [vmem:[%s3795_s11 + $0x400] sm:$0xff]  ;;  %v1359_v50 = vld [vmem:[%s3795_s11 + $0x4d0] sm:$0xff] }
  0xbc   : > { %v1384_v41 = vld [vmem:[%s3795_s11 + $0x598] sm:$0xff]  ;;  %v2213_v42 = vadd.f32 %v2181_v30, %v1346_v12  ;;  %v1353_v44 = vld [vmem:[%s3795_s11 + $0x4a0] sm:$0xff]  ;;  %v1993_v46 = vadd.f32 %v1961_v34, %v1383_v33  ;;  %v1713_v54 = vsel %vm1592_vm0, %v1325_v37, 0.0  ;;  %v1334_v55 = vld [vmem:[%s3795_s11 + $0x408] sm:$0xff] }
  0xbd   : > { %2399 = vadd.xlane.f32.xlu0 %v2236_v29  ;;  %v1385_v45 = vld [vmem:[%s3795_s11 + $0x5a0] sm:$0xff]  ;;  %v2179_v47 = vadd.f32 %v2147_v38, %v1323_v22  ;;  %v2116_v48 = vadd.f32 %v2084_v39, %v1332_v31  ;;  %v2054_v49 = vadd.f32 %v2022_v40, %v1352_v32  ;;  %v1360_v51 = vld [vmem:[%s3795_s11 + $0x4d8] sm:$0xff]  ;;  %v1335_v56 = vld [vmem:[%s3795_s11 + $0x410] sm:$0xff] }
  0xbe   : > { %v1361_v52 = vld [vmem:[%s3795_s11 + $0x4e0] sm:$0xff]  ;;  %v2245_v53 = vadd.f32 %v2213_v42, %v1735_v35  ;;  %v1354_v57 = vld [vmem:[%s3795_s11 + $0x4a8] sm:$0xff]  ;;  %v2025_v58 = vadd.f32 %v1993_v46, %v1384_v41  ;;  %v1959_v59 = vadd.f32 %v1360_v51, %v1359_v50  ;;  %v1336_v61 = vld [vmem:[%s3795_s11 + $0x418] sm:$0xff] }
  0xbf   : > { %v2211_v60 = vadd.f32 %v2179_v47, %v1324_v36  ;;  %v2148_v62 = vadd.f32 %v2116_v48, %v1333_v43  ;;  %v2086_v63 = vadd.f32 %v2054_v49, %v1353_v44  ;;  %v1386_v0 = vld [vmem:[%s3795_s11 + $0x5a8] sm:$0xff]  ;;  %v1355_v2 = vld [vmem:[%s3795_s11 + $0x4b0] sm:$0xff]  ;;  %v1372_v14 = vld [vmem:[%s3795_s11 + $0x538] sm:$0xff]  ;;  %v1724_v15 = vsel %vm1592_vm0, %v1336_v61, 0.0 }
  0xc0   : > { %v1362_v1 = vld [vmem:[%s3795_s11 + $0x4e8] sm:$0xff]  ;;  %2417 = vadd.xlane.f32.xlu1 %v2245_v53  ;;  %v1387_v4 = vld [vmem:[%s3795_s11 + $0x5b0] sm:$0xff]  ;;  %v2057_v5 = vadd.f32 %v2025_v58, %v1385_v45  ;;  %v1991_v6 = vadd.f32 %v1959_v59, %v1361_v52  ;;  %v1356_v16 = vld [vmem:[%s3795_s11 + $0x4b8] sm:$0xff] }
  0xc1   : > { %v1370_v7 = vld [vmem:[%s3795_s11 + $0x528] sm:$0xff]  ;;  %v2243_v8 = vadd.f32 %v2211_v60, %v1713_v54  ;;  %v2180_v9 = vadd.f32 %v2148_v62, %v1334_v55  ;;  %v2118_v10 = vadd.f32 %v2086_v63, %v1354_v57  ;;  %v1363_v12 = vld [vmem:[%s3795_s11 + $0x4f0] sm:$0xff]  ;;  %v1357_v17 = vld [vmem:[%s3795_s11 + $0x4c0] sm:$0xff] }
  0xc2   : > { %v1371_v13 = vld [vmem:[%s3795_s11 + $0x530] sm:$0xff]  ;;  %v1358_v18 = vld [vmem:[%s3795_s11 + $0x4c8] sm:$0xff]  ;;  %v2089_v19 = vadd.f32 %v2057_v5, %v1386_v0  ;;  %v2023_v20 = vadd.f32 %v1991_v6, %v1362_v1  ;;  %v1388_v25 = vld [vmem:[%s3795_s11 + $0x5b8] sm:$0xff] }
  0xc3   : > { %v1960_v21 = vadd.f32 %v1371_v13, %v1370_v7  ;;  %2413 = vadd.xlane.f32.xlu0 %v2243_v8  ;;  %v2212_v22 = vadd.f32 %v2180_v9, %v1335_v56  ;;  %v2150_v23 = vadd.f32 %v2118_v10, %v1355_v2  ;;  %v1364_v26 = vld [vmem:[%s3795_s11 + $0x4f8] sm:$0xff]  ;;  %v1373_v27 = vld [vmem:[%s3795_s11 + $0x540] sm:$0xff]  ;;  %v1374_v37 = vld [vmem:[%s3795_s11 + $0x548] sm:$0xff]  ;;  %v1746_v40 = vsel %vm1592_vm0, %v1358_v18, 0.0 }
  0xc4   : > { %v1389_v28 = vld [vmem:[%s3795_s11 + $0x5c0] sm:$0xff]  ;;  %v2121_v29 = vadd.f32 %v2089_v19, %v1387_v4  ;;  %v2055_v30 = vadd.f32 %v2023_v20, %v1363_v12  ;;  %v1392_v32 = vld [vmem:[%s3795_s11 + $0x5d8] sm:$0xff]  ;;  %v1394_v38 = vld [vmem:[%s3795_s11 + $0x5e8] sm:$0xff] }
  0xc5   : > { %v1992_v31 = vadd.f32 %v1960_v21, %v1372_v14  ;;  %v1393_v33 = vld [vmem:[%s3795_s11 + $0x5e0] sm:$0xff]  ;;  %v2244_v34 = vadd.f32 %v2212_v22, %v1724_v15  ;;  %v2182_v35 = vadd.f32 %v2150_v23, %v1356_v16  ;;  %v1390_v41 = vld [vmem:[%s3795_s11 + $0x5c8] sm:$0xff]  ;;  %v1391_v42 = vld [vmem:[%s3795_s11 + $0x5d0] sm:$0xff] }
  0xc6   : > { %v1365_v36 = vld [vmem:[%s3795_s11 + $0x500] sm:$0xff]  ;;  %v1962_v39 = vadd.f32 %v1393_v33, %v1392_v32  ;;  %v2153_v43 = vadd.f32 %v2121_v29, %v1388_v25  ;;  %v2087_v44 = vadd.f32 %v2055_v30, %v1364_v26  ;;  %v1395_v46 = vld [vmem:[%s3795_s11 + $0x5f0] sm:$0xff]  ;;  %v1366_v48 = vld [vmem:[%s3795_s11 + $0x508] sm:$0xff]  ;;  %v1779_v59 = vsel %vm1592_vm0, %v1391_v42, 0.0 }
  0xc7   : > { %v2024_v45 = vadd.f32 %v1992_v31, %v1373_v27  ;;  %2415 = vadd.xlane.f32.xlu1 %v2244_v34  ;;  %v2214_v47 = vadd.f32 %v2182_v35, %v1357_v17  ;;  %v1375_v49 = vld [vmem:[%s3795_s11 + $0x550] sm:$0xff]  ;;  %v1396_v50 = vld [vmem:[%s3795_s11 + $0x5f8] sm:$0xff]  ;;  %v1425_v55 = vld [vmem:[%s3795_s11 + $0x6e0] sm:$0xff] }
  0xc8   : > { %v1994_v51 = vadd.f32 %v1962_v39, %v1394_v38  ;;  %v2185_v52 = vadd.f32 %v2153_v43, %v1389_v28  ;;  %v2119_v53 = vadd.f32 %v2087_v44, %v1365_v36  ;;  %v1426_v56 = vld [vmem:[%s3795_s11 + $0x6e8] sm:$0xff]  ;;  %v1427_v57 = vld [vmem:[%s3795_s11 + $0x6f0] sm:$0xff]  ;;  %v1368_v61 = vld [vmem:[%s3795_s11 + $0x518] sm:$0xff] }
  0xc9   : > { %v2056_v54 = vadd.f32 %v2024_v45, %v1374_v37  ;;  %v2246_v58 = vadd.f32 %v2214_v47, %v1746_v40  ;;  %v1367_v60 = vld [vmem:[%s3795_s11 + $0x510] sm:$0xff]  ;;  %v1376_v62 = vld [vmem:[%s3795_s11 + $0x558] sm:$0xff]  ;;  %v1965_v0 = vadd.f32 %v1426_v56, %v1425_v55  ;;  %v1369_v2 = vld [vmem:[%s3795_s11 + $0x520] sm:$0xff] }
  0xca   : > { %v2026_v63 = vadd.f32 %v1994_v51, %v1395_v46  ;;  %v2217_v1 = vadd.f32 %v2185_v52, %v1390_v41  ;;  %v2151_v4 = vadd.f32 %v2119_v53, %v1366_v48  ;;  %v1397_v6 = vld [vmem:[%s3795_s11 + $0x600] sm:$0xff]  ;;  %v1428_v7 = vld [vmem:[%s3795_s11 + $0x6f8] sm:$0xff]  ;;  %v1398_v9 = vld [vmem:[%s3795_s11 + $0x608] sm:$0xff]  ;;  %v1757_v20 = vsel %vm1592_vm0, %v1369_v2, 0.0 }
  0xcb   : > { %v2088_v5 = vadd.f32 %v2056_v54, %v1375_v49  ;;  %2419 = vadd.xlane.f32.xlu0 %v2246_v58  ;;  %v1377_v8 = vld [vmem:[%s3795_s11 + $0x560] sm:$0xff]  ;;  %v1997_v12 = vadd.f32 %v1965_v0, %v1427_v57  ;;  %v1403_v13 = vld [vmem:[%s3795_s11 + $0x630] sm:$0xff]  ;;  %v1404_v18 = vld [vmem:[%s3795_s11 + $0x638] sm:$0xff] }
  0xcc   : > { %v2058_v10 = vadd.f32 %v2026_v63, %v1396_v50  ;;  %v2249_v14 = vadd.f32 %v2217_v1, %v1779_v59  ;;  %v2183_v15 = vadd.f32 %v2151_v4, %v1367_v60  ;;  %v1429_v17 = vld [vmem:[%s3795_s11 + $0x700] sm:$0xff]  ;;  %v1378_v21 = vld [vmem:[%s3795_s11 + $0x568] sm:$0xff]  ;;  %v1379_v22 = vld [vmem:[%s3795_s11 + $0x570] sm:$0xff]  ;;  %v1963_v27 = vadd.f32 %v1404_v18, %v1403_v13 }
  0xcd   : > { %v2120_v16 = vadd.f32 %v2088_v5, %v1376_v62  ;;  %v1405_v19 = vld [vmem:[%s3795_s11 + $0x640] sm:$0xff]  ;;  %v1380_v23 = vld [vmem:[%s3795_s11 + $0x578] sm:$0xff]  ;;  %v2029_v26 = vadd.f32 %v1997_v12, %v1428_v7  ;;  %v1399_v30 = vld [vmem:[%s3795_s11 + $0x610] sm:$0xff] }
  0xce   : > { %v2090_v25 = vadd.f32 %v2058_v10, %v1397_v6  ;;  %2425 = vadd.xlane.f32.xlu1 %v2249_v14  ;;  %v2215_v28 = vadd.f32 %v2183_v15, %v1368_v61  ;;  %v1430_v31 = vld [vmem:[%s3795_s11 + $0x708] sm:$0xff]  ;;  %v1400_v33 = vld [vmem:[%s3795_s11 + $0x618] sm:$0xff]  ;;  %v1995_v36 = vadd.f32 %v1963_v27, %v1405_v19  ;;  %v1415_v38 = vld [vmem:[%s3795_s11 + $0x690] sm:$0xff]  ;;  %v1768_v45 = vsel %vm1592_vm0, %v1380_v23, 0.0 }
  0xcf   : > { %v2152_v29 = vadd.f32 %v2120_v16, %v1377_v8  ;;  %v1406_v32 = vld [vmem:[%s3795_s11 + $0x648] sm:$0xff]  ;;  %v2061_v35 = vadd.f32 %v2029_v26, %v1429_v17  ;;  %v1431_v41 = vld [vmem:[%s3795_s11 + $0x710] sm:$0xff]  ;;  %v1416_v43 = vld [vmem:[%s3795_s11 + $0x698] sm:$0xff] }
  0xd0   : > { %v2122_v34 = vadd.f32 %v2090_v25, %v1398_v9  ;;  %v1414_v37 = vld [vmem:[%s3795_s11 + $0x688] sm:$0xff]  ;;  %v2247_v39 = vadd.f32 %v2215_v28, %v1757_v20  ;;  %v1407_v42 = vld [vmem:[%s3795_s11 + $0x650] sm:$0xff]  ;;  %v1401_v46 = vld [vmem:[%s3795_s11 + $0x620] sm:$0xff]  ;;  %v2027_v50 = vadd.f32 %v1995_v36, %v1406_v32 }
  0xd1   : > { %v2184_v40 = vadd.f32 %v2152_v29, %v1378_v21  ;;  %v1964_v44 = vadd.f32 %v1415_v38, %v1414_v37  ;;  %v1402_v47 = vld [vmem:[%s3795_s11 + $0x628] sm:$0xff]  ;;  %v2093_v49 = vadd.f32 %v2061_v35, %v1430_v31  ;;  %v1417_v51 = vld [vmem:[%s3795_s11 + $0x6a0] sm:$0xff]  ;;  %v1432_v53 = vld [vmem:[%s3795_s11 + $0x718] sm:$0xff] }
  0xd2   : > { %v2154_v48 = vadd.f32 %v2122_v34, %v1399_v30  ;;  %2421 = vadd.xlane.f32.xlu0 %v2247_v39  ;;  %v1408_v54 = vld [vmem:[%s3795_s11 + $0x658] sm:$0xff]  ;;  %v1418_v55 = vld [vmem:[%s3795_s11 + $0x6a8] sm:$0xff]  ;;  %v2059_v59 = vadd.f32 %v2027_v50, %v1407_v42  ;;  %v1437_v61 = vld [vmem:[%s3795_s11 + $0x740] sm:$0xff]  ;;  %v1790_v0 = vsel %vm1592_vm0, %v1402_v47, 0.0 }
  0xd3   : > { %v2216_v52 = vadd.f32 %v2184_v40, %v1379_v22  ;;  %v1996_v56 = vadd.f32 %v1964_v44, %v1416_v43  ;;  %v2125_v58 = vadd.f32 %v2093_v49, %v1431_v41  ;;  %v1436_v60 = vld [vmem:[%s3795_s11 + $0x738] sm:$0xff]  ;;  %v1438_v62 = vld [vmem:[%s3795_s11 + $0x748] sm:$0xff]  ;;  %v1433_v1 = vld [vmem:[%s3795_s11 + $0x720] sm:$0xff] }
  0xd4   : > { %v2186_v57 = vadd.f32 %v2154_v48, %v1400_v33  ;;  %v1434_v2 = vld [vmem:[%s3795_s11 + $0x728] sm:$0xff]  ;;  %v1409_v4 = vld [vmem:[%s3795_s11 + $0x660] sm:$0xff]  ;;  %v1966_v6 = vadd.f32 %v1437_v61, %v1436_v60  ;;  %v1435_v8 = vld [vmem:[%s3795_s11 + $0x730] sm:$0xff]  ;;  %v2091_v10 = vadd.f32 %v2059_v59, %v1408_v54 }
  0xd5   : > { %v2248_v63 = vadd.f32 %v2216_v52, %v1768_v45  ;;  %v2028_v5 = vadd.f32 %v1996_v56, %v1417_v51  ;;  %v2157_v9 = vadd.f32 %v2125_v58, %v1432_v53  ;;  %v1419_v12 = vld [vmem:[%s3795_s11 + $0x6b0] sm:$0xff]  ;;  %v1410_v14 = vld [vmem:[%s3795_s11 + $0x668] sm:$0xff]  ;;  %v1420_v15 = vld [vmem:[%s3795_s11 + $0x6b8] sm:$0xff]  ;;  %v1823_v26 = vsel %vm1592_vm0, %v1435_v8, 0.0 }
  0xd6   : > { %v2218_v7 = vadd.f32 %v2186_v57, %v1401_v46  ;;  %v1439_v13 = vld [vmem:[%s3795_s11 + $0x750] sm:$0xff]  ;;  %v1998_v17 = vadd.f32 %v1966_v6, %v1438_v62  ;;  %v1469_v18 = vld [vmem:[%s3795_s11 + $0x840] sm:$0xff]  ;;  %v2123_v21 = vadd.f32 %v2091_v10, %v1409_v4  ;;  %v1440_v22 = vld [vmem:[%s3795_s11 + $0x758] sm:$0xff] }
  0xd7   : > { %2423 = vadd.xlane.f32.xlu1 %v2248_v63  ;;  %v2060_v16 = vadd.f32 %v2028_v5, %v1418_v55  ;;  %v2189_v20 = vadd.f32 %v2157_v9, %v1433_v1  ;;  %v1470_v23 = vld [vmem:[%s3795_s11 + $0x848] sm:$0xff]  ;;  %v1471_v25 = vld [vmem:[%s3795_s11 + $0x850] sm:$0xff]  ;;  %v1412_v28 = vld [vmem:[%s3795_s11 + $0x678] sm:$0xff] }
  0xd8   : > { %v2250_v19 = vadd.f32 %v2218_v7, %v1790_v0  ;;  %v1411_v27 = vld [vmem:[%s3795_s11 + $0x670] sm:$0xff]  ;;  %v1413_v29 = vld [vmem:[%s3795_s11 + $0x680] sm:$0xff]  ;;  %v2030_v31 = vadd.f32 %v1998_v17, %v1439_v13  ;;  %v1969_v32 = vadd.f32 %v1470_v23, %v1469_v18  ;;  %v2155_v34 = vadd.f32 %v2123_v21, %v1410_v14  ;;  %v1472_v37 = vld [vmem:[%s3795_s11 + $0x858] sm:$0xff] }
  0xd9   : > { %v2092_v30 = vadd.f32 %v2060_v16, %v1419_v12  ;;  %v2221_v33 = vadd.f32 %v2189_v20, %v1434_v2  ;;  %v1421_v35 = vld [vmem:[%s3795_s11 + $0x6c0] sm:$0xff]  ;;  %v1422_v38 = vld [vmem:[%s3795_s11 + $0x6c8] sm:$0xff]  ;;  %v1447_v42 = vld [vmem:[%s3795_s11 + $0x790] sm:$0xff]  ;;  %v1801_v50 = vsel %vm1592_vm0, %v1413_v29, 0.0 }
  0xda   : > { %2427 = vadd.xlane.f32.xlu0 %v2250_v19  ;;  %v1441_v36 = vld [vmem:[%s3795_s11 + $0x760] sm:$0xff]  ;;  %v2062_v40 = vadd.f32 %v2030_v31, %v1440_v22  ;;  %v2001_v41 = vadd.f32 %v1969_v32, %v1471_v25  ;;  %v1448_v43 = vld [vmem:[%s3795_s11 + $0x798] sm:$0xff]  ;;  %v2187_v45 = vadd.f32 %v2155_v34, %v1411_v27  ;;  %v1442_v46 = vld [vmem:[%s3795_s11 + $0x768] sm:$0xff] }
  0xdb   : > { %v2124_v39 = vadd.f32 %v2092_v30, %v1420_v15  ;;  %v2253_v44 = vadd.f32 %v2221_v33, %v1823_v26  ;;  %v1473_v47 = vld [vmem:[%s3795_s11 + $0x860] sm:$0xff]  ;;  %v1967_v49 = vadd.f32 %v1448_v43, %v1447_v42  ;;  %v1423_v51 = vld [vmem:[%s3795_s11 + $0x6d0] sm:$0xff]  ;;  %v1424_v52 = vld [vmem:[%s3795_s11 + $0x6d8] sm:$0xff] }
  0xdc   : > { %v1449_v48 = vld [vmem:[%s3795_s11 + $0x7a0] sm:$0xff]  ;;  %v2094_v54 = vadd.f32 %v2062_v40, %v1441_v36  ;;  %v2033_v55 = vadd.f32 %v2001_v41, %v1472_v37  ;;  %v1450_v56 = vld [vmem:[%s3795_s11 + $0x7a8] sm:$0xff]  ;;  %v2219_v57 = vadd.f32 %v2187_v45, %v1412_v28  ;;  %v1443_v58 = vld [vmem:[%s3795_s11 + $0x770] sm:$0xff]  ;;  %v1812_v6 = vsel %vm1592_vm0, %v1424_v52, 0.0 }
  0xdd   : > { %v2156_v53 = vadd.f32 %v2124_v39, %v1421_v35  ;;  %2433 = vadd.xlane.f32.xlu1 %v2253_v44  ;;  %v1474_v59 = vld [vmem:[%s3795_s11 + $0x868] sm:$0xff]  ;;  %v1451_v60 = vld [vmem:[%s3795_s11 + $0x7b0] sm:$0xff]  ;;  %v1999_v61 = vadd.f32 %v1967_v49, %v1449_v48  ;;  %v1460_v4 = vld [vmem:[%s3795_s11 + $0x7f8] sm:$0xff] }
  0xde   : > { %v2126_v63 = vadd.f32 %v2094_v54, %v1442_v46  ;;  %v2065_v0 = vadd.f32 %v2033_v55, %v1473_v47  ;;  %v1458_v1 = vld [vmem:[%s3795_s11 + $0x7e8] sm:$0xff]  ;;  %v1459_v2 = vld [vmem:[%s3795_s11 + $0x7f0] sm:$0xff]  ;;  %v2251_v5 = vadd.f32 %v2219_v57, %v1801_v50  ;;  %v1444_v7 = vld [vmem:[%s3795_s11 + $0x778] sm:$0xff] }
  0xdf   : > { %v2188_v62 = vadd.f32 %v2156_v53, %v1422_v38  ;;  %v1445_v8 = vld [vmem:[%s3795_s11 + $0x780] sm:$0xff]  ;;  %v1475_v9 = vld [vmem:[%s3795_s11 + $0x870] sm:$0xff]  ;;  %v2031_v10 = vadd.f32 %v1999_v61, %v1450_v56  ;;  %v1968_v12 = vadd.f32 %v1459_v2, %v1458_v1  ;;  %v1446_v14 = vld [vmem:[%s3795_s11 + $0x788] sm:$0xff] }
  0xe0   : > { %v2158_v15 = vadd.f32 %v2126_v63, %v1443_v58  ;;  %v2097_v16 = vadd.f32 %v2065_v0, %v1474_v59  ;;  %v1452_v17 = vld [vmem:[%s3795_s11 + $0x7b8] sm:$0xff]  ;;  %v1461_v18 = vld [vmem:[%s3795_s11 + $0x800] sm:$0xff]  ;;  %2429 = vadd.xlane.f32.xlu0 %v2251_v5  ;;  %v1462_v28 = vld [vmem:[%s3795_s11 + $0x808] sm:$0xff]  ;;  %v1834_v31 = vsel %vm1592_vm0, %v1446_v14, 0.0 }
  0xe1   : > { %v2220_v13 = vadd.f32 %v2188_v62, %v1423_v51  ;;  %v1476_v19 = vld [vmem:[%s3795_s11 + $0x878] sm:$0xff]  ;;  %v1453_v20 = vld [vmem:[%s3795_s11 + $0x7c0] sm:$0xff]  ;;  %v2063_v21 = vadd.f32 %v2031_v10, %v1451_v60  ;;  %v2000_v22 = vadd.f32 %v1968_v12, %v1460_v4  ;;  %v1482_v30 = vld [vmem:[%s3795_s11 + $0x8a8] sm:$0xff] }
  0xe2   : > { %v1480_v23 = vld [vmem:[%s3795_s11 + $0x898] sm:$0xff]  ;;  %v2190_v26 = vadd.f32 %v2158_v15, %v1444_v7  ;;  %v2129_v27 = vadd.f32 %v2097_v16, %v1475_v9  ;;  %v1481_v29 = vld [vmem:[%s3795_s11 + $0x8a0] sm:$0xff]  ;;  %v1478_v33 = vld [vmem:[%s3795_s11 + $0x888] sm:$0xff] }
  0xe3   : > { %v2252_v25 = vadd.f32 %v2220_v13, %v1812_v6  ;;  %v1477_v32 = vld [vmem:[%s3795_s11 + $0x880] sm:$0xff]  ;;  %v1479_v34 = vld [vmem:[%s3795_s11 + $0x890] sm:$0xff]  ;;  %v2095_v35 = vadd.f32 %v2063_v21, %v1452_v17  ;;  %v2032_v36 = vadd.f32 %v2000_v22, %v1461_v18  ;;  %v1970_v37 = vadd.f32 %v1481_v29, %v1480_v23  ;;  %v1454_v40 = vld [vmem:[%s3795_s11 + $0x7c8] sm:$0xff] }
  0xe4   : > { %v2222_v38 = vadd.f32 %v2190_v26, %v1445_v8  ;;  %v2161_v39 = vadd.f32 %v2129_v27, %v1476_v19  ;;  %v1463_v41 = vld [vmem:[%s3795_s11 + $0x810] sm:$0xff]  ;;  %v1513_v47 = vld [vmem:[%s3795_s11 + $0x9a0] sm:$0xff]  ;;  %v1514_v48 = vld [vmem:[%s3795_s11 + $0x9a8] sm:$0xff]  ;;  %v1867_v55 = vsel %vm1592_vm0, %v1479_v34, 0.0 }
  0xe5   : > { %2431 = vadd.xlane.f32.xlu1 %v2252_v25  ;;  %v1483_v42 = vld [vmem:[%s3795_s11 + $0x8b0] sm:$0xff]  ;;  %v2127_v44 = vadd.f32 %v2095_v35, %v1453_v20  ;;  %v2064_v45 = vadd.f32 %v2032_v36, %v1462_v28  ;;  %v2002_v46 = vadd.f32 %v1970_v37, %v1482_v30  ;;  %v1464_v51 = vld [vmem:[%s3795_s11 + $0x818] sm:$0xff]  ;;  %v1973_v54 = vadd.f32 %v1514_v48, %v1513_v47  ;;  %v1457_v57 = vld [vmem:[%s3795_s11 + $0x7e0] sm:$0xff] }
  0xe6   : > { %v1455_v43 = vld [vmem:[%s3795_s11 + $0x7d0] sm:$0xff]  ;;  %v2254_v49 = vadd.f32 %v2222_v38, %v1834_v31  ;;  %v2193_v50 = vadd.f32 %v2161_v39, %v1477_v32  ;;  %v1484_v52 = vld [vmem:[%s3795_s11 + $0x8b8] sm:$0xff]  ;;  %v1465_v63 = vld [vmem:[%s3795_s11 + $0x820] sm:$0xff]  ;;  %v1845_v12 = vsel %vm1592_vm0, %v1457_v57, 0.0 }
  0xe7   : > { %v1515_v53 = vld [vmem:[%s3795_s11 + $0x9b0] sm:$0xff]  ;;  %v1456_v56 = vld [vmem:[%s3795_s11 + $0x7d8] sm:$0xff]  ;;  %v2159_v58 = vadd.f32 %v2127_v44, %v1454_v40  ;;  %v2096_v59 = vadd.f32 %v2064_v45, %v1463_v41  ;;  %v2034_v60 = vadd.f32 %v2002_v46, %v1483_v42  ;;  %v1485_v0 = vld [vmem:[%s3795_s11 + $0x8c0] sm:$0xff] }
  0xe8   : > { %v1516_v61 = vld [vmem:[%s3795_s11 + $0x9b8] sm:$0xff]  ;;  %2435 = vadd.xlane.f32.xlu0 %v2254_v49  ;;  %v2225_v62 = vadd.f32 %v2193_v50, %v1478_v33  ;;  %v1517_v1 = vld [vmem:[%s3795_s11 + $0x9c0] sm:$0xff]  ;;  %v2005_v2 = vadd.f32 %v1973_v54, %v1515_v53  ;;  %v1491_v7 = vld [vmem:[%s3795_s11 + $0x8f0] sm:$0xff] }
  0xe9   : > { %v2191_v4 = vadd.f32 %v2159_v58, %v1455_v43  ;;  %v2128_v5 = vadd.f32 %v2096_v59, %v1464_v51  ;;  %v2066_v6 = vadd.f32 %v2034_v60, %v1484_v52  ;;  %v1492_v8 = vld [vmem:[%s3795_s11 + $0x8f8] sm:$0xff]  ;;  %v1493_v9 = vld [vmem:[%s3795_s11 + $0x900] sm:$0xff]  ;;  %v1466_v13 = vld [vmem:[%s3795_s11 + $0x828] sm:$0xff] }
  0xea   : > { %v2257_v10 = vadd.f32 %v2225_v62, %v1867_v55  ;;  %v1467_v14 = vld [vmem:[%s3795_s11 + $0x830] sm:$0xff]  ;;  %v1486_v15 = vld [vmem:[%s3795_s11 + $0x8c8] sm:$0xff]  ;;  %v2037_v16 = vadd.f32 %v2005_v2, %v1516_v61  ;;  %v1971_v17 = vadd.f32 %v1492_v8, %v1491_v7  ;;  %v1468_v19 = vld [vmem:[%s3795_s11 + $0x838] sm:$0xff] }
  0xeb   : > { %v2223_v18 = vadd.f32 %v2191_v4, %v1456_v56  ;;  %v2160_v20 = vadd.f32 %v2128_v5, %v1465_v63  ;;  %v2098_v21 = vadd.f32 %v2066_v6, %v1485_v0  ;;  %v1518_v22 = vld [vmem:[%s3795_s11 + $0x9c8] sm:$0xff]  ;;  %v1487_v25 = vld [vmem:[%s3795_s11 + $0x8d0] sm:$0xff]  ;;  %v1504_v35 = vld [vmem:[%s3795_s11 + $0x958] sm:$0xff]  ;;  %v1856_v36 = vsel %vm1592_vm0, %v1468_v19, 0.0 }
  0xec   : > { %v1494_v23 = vld [vmem:[%s3795_s11 + $0x908] sm:$0xff]  ;;  %2441 = vadd.xlane.f32.xlu1 %v2257_v10  ;;  %v1519_v26 = vld [vmem:[%s3795_s11 + $0x9d0] sm:$0xff]  ;;  %v2069_v27 = vadd.f32 %v2037_v16, %v1517_v1  ;;  %v2003_v28 = vadd.f32 %v1971_v17, %v1493_v9  ;;  %v1488_v37 = vld [vmem:[%s3795_s11 + $0x8d8] sm:$0xff] }
  0xed   : > { %v1502_v29 = vld [vmem:[%s3795_s11 + $0x948] sm:$0xff]  ;;  %v2255_v30 = vadd.f32 %v2223_v18, %v1845_v12  ;;  %v2192_v31 = vadd.f32 %v2160_v20, %v1466_v13  ;;  %v2130_v32 = vadd.f32 %v2098_v21, %v1486_v15  ;;  %v1495_v33 = vld [vmem:[%s3795_s11 + $0x910] sm:$0xff]  ;;  %v1489_v38 = vld [vmem:[%s3795_s11 + $0x8e0] sm:$0xff] }
  0xee   : > { %v1503_v34 = vld [vmem:[%s3795_s11 + $0x950] sm:$0xff]  ;;  %v1490_v39 = vld [vmem:[%s3795_s11 + $0x8e8] sm:$0xff]  ;;  %v2101_v40 = vadd.f32 %v2069_v27, %v1518_v22  ;;  %v2035_v41 = vadd.f32 %v2003_v28, %v1494_v23  ;;  %v1520_v45 = vld [vmem:[%s3795_s11 + $0x9d8] sm:$0xff] }
  0xef   : > { %v1972_v42 = vadd.f32 %v1503_v34, %v1502_v29  ;;  %2437 = vadd.xlane.f32.xlu0 %v2255_v30  ;;  %v2224_v43 = vadd.f32 %v2192_v31, %v1467_v14  ;;  %v2162_v44 = vadd.f32 %v2130_v32, %v1487_v25  ;;  %v1496_v46 = vld [vmem:[%s3795_s11 + $0x918] sm:$0xff]  ;;  %v1505_v47 = vld [vmem:[%s3795_s11 + $0x960] sm:$0xff]  ;;  %v1506_v57 = vld [vmem:[%s3795_s11 + $0x968] sm:$0xff]  ;;  %v1878_v60 = vsel %vm1592_vm0, %v1490_v39, 0.0 }
  0xf0   : > { %v1521_v48 = vld [vmem:[%s3795_s11 + $0x9e0] sm:$0xff]  ;;  %v2133_v49 = vadd.f32 %v2101_v40, %v1519_v26  ;;  %v2067_v50 = vadd.f32 %v2035_v41, %v1495_v33  ;;  %v1524_v52 = vld [vmem:[%s3795_s11 + $0x9f8] sm:$0xff]  ;;  %v1526_v58 = vld [vmem:[%s3795_s11 + $0xa08] sm:$0xff] }
  0xf1   : > { %v2004_v51 = vadd.f32 %v1972_v42, %v1504_v35  ;;  %v1525_v53 = vld [vmem:[%s3795_s11 + $0xa00] sm:$0xff]  ;;  %v2256_v54 = vadd.f32 %v2224_v43, %v1856_v36  ;;  %v2194_v55 = vadd.f32 %v2162_v44, %v1488_v37  ;;  %v1522_v61 = vld [vmem:[%s3795_s11 + $0x9e8] sm:$0xff]  ;;  %v1523_v62 = vld [vmem:[%s3795_s11 + $0x9f0] sm:$0xff] }
  0xf2   : > { %v1497_v56 = vld [vmem:[%s3795_s11 + $0x920] sm:$0xff]  ;;  %v1974_v59 = vadd.f32 %v1525_v53, %v1524_v52  ;;  %v2165_v63 = vadd.f32 %v2133_v49, %v1520_v45  ;;  %v2099_v0 = vadd.f32 %v2067_v50, %v1496_v46  ;;  %v1527_v2 = vld [vmem:[%s3795_s11 + $0xa10] sm:$0xff]  ;;  %v1498_v5 = vld [vmem:[%s3795_s11 + $0x928] sm:$0xff]  ;;  %v1911_v17 = vsel %vm1592_vm0, %v1523_v62, 0.0 }
  0xf3   : > { %v2036_v1 = vadd.f32 %v2004_v51, %v1505_v47  ;;  %2439 = vadd.xlane.f32.xlu1 %v2256_v54  ;;  %v2226_v4 = vadd.f32 %v2194_v55, %v1489_v38  ;;  %v1507_v6 = vld [vmem:[%s3795_s11 + $0x970] sm:$0xff]  ;;  %v1528_v7 = vld [vmem:[%s3795_s11 + $0xa18] sm:$0xff]  ;;  %v1537_v15 = vld [vmem:[%s3795_s11 + $0xa60] sm:$0xff] }
  0xf4   : > { %v2006_v8 = vadd.f32 %v1974_v59, %v1526_v58  ;;  %v2197_v9 = vadd.f32 %v2165_v63, %v1521_v48  ;;  %v2131_v10 = vadd.f32 %v2099_v0, %v1497_v56  ;;  %v1535_v13 = vld [vmem:[%s3795_s11 + $0xa50] sm:$0xff]  ;;  %v1536_v14 = vld [vmem:[%s3795_s11 + $0xa58] sm:$0xff]  ;;  %v1501_v25 = vld [vmem:[%s3795_s11 + $0x940] sm:$0xff] }
  0xf5   : > { %v2068_v12 = vadd.f32 %v2036_v1, %v1506_v57  ;;  %v2258_v16 = vadd.f32 %v2226_v4, %v1878_v60  ;;  %v1499_v18 = vld [vmem:[%s3795_s11 + $0x930] sm:$0xff]  ;;  %v1500_v19 = vld [vmem:[%s3795_s11 + $0x938] sm:$0xff]  ;;  %v1975_v22 = vadd.f32 %v1536_v14, %v1535_v13  ;;  %v1529_v28 = vld [vmem:[%s3795_s11 + $0xa20] sm:$0xff]  ;;  %v1889_v41 = vsel %vm1592_vm0, %v1501_v25, 0.0 }
  0xf6   : > { %v1508_v20 = vld [vmem:[%s3795_s11 + $0x978] sm:$0xff]  ;;  %v2038_v21 = vadd.f32 %v2006_v8, %v1527_v2  ;;  %v2229_v23 = vadd.f32 %v2197_v9, %v1522_v61  ;;  %v2163_v26 = vadd.f32 %v2131_v10, %v1498_v5  ;;  %v1538_v29 = vld [vmem:[%s3795_s11 + $0xa68] sm:$0xff]  ;;  %v1509_v30 = vld [vmem:[%s3795_s11 + $0x980] sm:$0xff] }
  0xf7   : > { %v2100_v27 = vadd.f32 %v2068_v12, %v1507_v6  ;;  %2443 = vadd.xlane.f32.xlu0 %v2258_v16  ;;  %v1530_v31 = vld [vmem:[%s3795_s11 + $0xa28] sm:$0xff]  ;;  %v2007_v33 = vadd.f32 %v1975_v22, %v1537_v15  ;;  %v1539_v38 = vld [vmem:[%s3795_s11 + $0xa70] sm:$0xff]  ;;  %v1548_v40 = vld [vmem:[%s3795_s11 + $0xab8] sm:$0xff] }
  0xf8   : > { %v2070_v32 = vadd.f32 %v2038_v21, %v1528_v7  ;;  %v1546_v34 = vld [vmem:[%s3795_s11 + $0xaa8] sm:$0xff]  ;;  %v2261_v35 = vadd.f32 %v2229_v23, %v1911_v17  ;;  %v2195_v36 = vadd.f32 %v2163_v26, %v1499_v18  ;;  %v1547_v39 = vld [vmem:[%s3795_s11 + $0xab0] sm:$0xff]  ;;  %v1512_v43 = vld [vmem:[%s3795_s11 + $0x998] sm:$0xff] }
  0xf9   : > { %v2132_v37 = vadd.f32 %v2100_v27, %v1508_v20  ;;  %v1510_v42 = vld [vmem:[%s3795_s11 + $0x988] sm:$0xff]  ;;  %v2039_v45 = vadd.f32 %v2007_v33, %v1538_v29  ;;  %v1976_v46 = vadd.f32 %v1547_v39, %v1546_v34  ;;  %v1531_v49 = vld [vmem:[%s3795_s11 + $0xa30] sm:$0xff]  ;;  %v1540_v50 = vld [vmem:[%s3795_s11 + $0xa78] sm:$0xff]  ;;  %v1900_v61 = vsel %vm1592_vm0, %v1512_v43, 0.0 }
  0xfa   : > { %v2102_v44 = vadd.f32 %v2070_v32, %v1529_v28  ;;  %2449 = vadd.xlane.f32.xlu1 %v2261_v35  ;;  %v2227_v47 = vadd.f32 %v2195_v36, %v1500_v19  ;;  %v1549_v51 = vld [vmem:[%s3795_s11 + $0xac0] sm:$0xff]  ;;  %v1511_v52 = vld [vmem:[%s3795_s11 + $0x990] sm:$0xff]  ;;  %v1532_v58 = vld [vmem:[%s3795_s11 + $0xa38] sm:$0xff]  ;;  %v3557_v36 = vmov 0.0  }
  0xfb   : > { %v2164_v48 = vadd.f32 %v2132_v37, %v1509_v30  ;;  %v2071_v54 = vadd.f32 %v2039_v45, %v1539_v38  ;;  %v2008_v55 = vadd.f32 %v1976_v46, %v1548_v40  ;;  %v1541_v59 = vld [vmem:[%s3795_s11 + $0xa80] sm:$0xff]  ;;  %v1550_v60 = vld [vmem:[%s3795_s11 + $0xac8] sm:$0xff]  ;;  %v1551_v6 = vld [vmem:[%s3795_s11 + $0xad0] sm:$0xff]  ;;  %3165 = vmatprep.subr.mxu0 %v3557_v36  ;;  %2896 = vmatprep.mubr.f32.mxu1 %v3557_v36 }
  0xfc   : > { %v2134_v53 = vadd.f32 %v2102_v44, %v1530_v31  ;;  %v2259_v56 = vadd.f32 %v2227_v47, %v1889_v41  ;;  %v1534_v62 = vld [vmem:[%s3795_s11 + $0xa48] sm:$0xff]  ;;  %v1533_v4 = vld [vmem:[%s3795_s11 + $0xa40] sm:$0xff]  ;;  %v1543_v13 = vld [vmem:[%s3795_s11 + $0xa90] sm:$0xff]  ;;  %3173 = vmatprep.mubr.msk.f32.mxu0 %vm3558_vm1, %v3557_v36 }
  0xfd   : > { %v2196_v57 = vadd.f32 %v2164_v48, %v1510_v42  ;;  %v2103_v0 = vadd.f32 %v2071_v54, %v1540_v50  ;;  %v2040_v1 = vadd.f32 %v2008_v55, %v1549_v51  ;;  %v1542_v5 = vld [vmem:[%s3795_s11 + $0xa88] sm:$0xff]  ;;  %v1922_v12 = vsel %vm1592_vm0, %v1534_v62, 0.0  ;;  %v1552_v14 = vld [vmem:[%s3795_s11 + $0xad8] sm:$0xff]  ;;  %v1545_v16 = vld [vmem:[%s3795_s11 + $0xaa0] sm:$0xff] }
  0xfe   : > { %v2166_v63 = vadd.f32 %v2134_v53, %v1531_v49  ;;  %2445 = vadd.xlane.f32.xlu0 %v2259_v56  ;;  %v1544_v19 = vld [vmem:[%s3795_s11 + $0xa98] sm:$0xff]  ;;  %v1553_v20 = vld [vmem:[%s3795_s11 + $0xae0] sm:$0xff]  ;;  %v1933_v25 = vsel %vm1592_vm0, %v1545_v16, 0.0  ;;  %v1554_v26 = vld [vmem:[%s3795_s11 + $0xae8] sm:$0xff]  ;;  %v2536_v62 = vadd.s32 4294967288, %v3822_v11 }
  0xff   : > { %v2228_v2 = vadd.f32 %v2196_v57, %v1511_v52  ;;  %v2135_v8 = vadd.f32 %v2103_v0, %v1541_v59  ;;  %v2072_v9 = vadd.f32 %v2040_v1, %v1550_v60  ;;  %v1556_v28 = vld [vmem:[%s3795_s11 + $0xaf8] sm:$0xff]  ;;  %v1555_v30 = vld [vmem:[%s3795_s11 + $0xaf0] sm:$0xff]  ;;  %v2490_v38 = vld [vmem:[%s4413_s1 + $0x8] sm:$0xff]  ;;  %v2543_v0 = vadd.s32 4294967280, %v3822_v11 }
 0x100   : > { %v2198_v7 = vadd.f32 %v2166_v63, %v1532_v58  ;;  %v1944_v33 = vsel %vm1592_vm0, %v1556_v28, 0.0  ;;  %v2492_v37 = vld [vmem:[%s4413_s1 + $0x18] sm:$0xff]  ;;  %v2491_v24 = vld [vmem:[%s4413_s1 + $0x10] sm:$0xff]  ;;  %v2489_v39 = vld [vmem:[%s4413_s1] sm:$0xff]  ;;  %v4271_v63 = vshrl.u32 %v1557_v3, 7 }
 0x101   : > { %v2260_v10 = vadd.f32 %v2228_v2, %v1900_v61  ;;  %v2167_v17 = vadd.f32 %v2135_v8, %v1542_v5  ;;  %v2104_v18 = vadd.f32 %v2072_v9, %v1551_v6  ;;  %3166 = vmatpush3.msra.mxu0 %v2492_v37  ;;  %v2550_v2 = vadd.s32 4294967272, %v3822_v11 }
 0x102   : > { %v2230_v15 = vadd.f32 %v2198_v7, %v1533_v4  ;;  %3167 = vmatprep.subr.mxu0 %v3557_v36  ;;  %v4280_v5 = vsub.s32 %v2536_v62, %v4271_v63  ;;  %v4284_v7 = vsub.s32 %v3822_v11, %v4271_v63  ;;  %v4287_v3 = vsub.s32 %v2543_v0, %v4271_v63 }
 0x103   : > { %2447 = vadd.xlane.f32.xlu1 %v2260_v10  ;;  %v2199_v22 = vadd.f32 %v2167_v17, %v1543_v13  ;;  %v2136_v23 = vadd.f32 %v2104_v18, %v1552_v14  ;;  %3168 = vmatpush3.msra.mxu0 %v2491_v24  ;;  %v4290_v14 = vsub.s32 %v2550_v2, %v4271_v63 }
 0x104   : > { %v2262_v21 = vadd.f32 %v2230_v15, %v1922_v12  ;;  %3169 = vmatprep.subr.mxu0 %v3557_v36 }
 0x105   : > { %v2231_v27 = vadd.f32 %v2199_v22, %v1544_v19  ;;  %v2168_v29 = vadd.f32 %v2136_v23, %v1553_v20  ;;  %3170 = vmatpush3.msra.mxu0 %v2490_v38 }
 0x106   : > { %2451 = vadd.xlane.f32.xlu0 %v2262_v21  ;;  %3171 = vmatprep.subr.mxu0 %v3557_v36 }
 0x107   : > { %v2263_v31 = vadd.f32 %v2231_v27, %v1933_v25  ;;  %v2200_v32 = vadd.f32 %v2168_v29, %v1554_v26  ;;  %3172 = vmatpush3.msra.mxu0 %v2489_v39 }
 0x109   : > { %v2232_v34 = vadd.f32 %v2200_v32, %v1555_v30 }
 0x10a   : > { %2453 = vadd.xlane.f32.xlu0 %v2263_v31 }
 0x10b   : > { %v2264_v35 = vadd.f32 %v2232_v34, %v1944_v33 }
 0x10d   : > { %2455 = vadd.xlane.f32.xlu1 %v2264_v35 }
 0x128   : > { %v2402_v40 = vpop.xlane.xlu1 %2401 }
 0x129   : > { %v2461_v9 = vmul.f32 0.00077160494, %v2402_v40 }
 0x12a   : > { %v2394_v41 = vpop.xlane.xlu0 %2393 }
 0x12b   : > { %v2457_v13 = vmul.f32 0.00077160494, %v2394_v41  ;;  %v2560_v22 = vrot.slane %v2461_v9, %v4284_v7 }
 0x12c   : > { %v2404_v42 = vpop.xlane.xlu1 %2403 }
 0x12d   : > { %v2462_v6 = vmul.f32 0.00077160494, %v2404_v42  ;;  %v2535_v27 = vrot.slane %v2457_v13, %v4284_v7 }
 0x12f   : > { %v2396_v43 = vpop.xlane.xlu0 %2395  ;;  %v2564_v17 = vrot.slane %v2462_v6, %v4280_v5 }
 0x130   : > { %v2458_v8 = vmul.f32 0.00077160494, %v2396_v43 }
 0x131   : > { %v2565_v31 = vsel %vm2541_vm2, %v2564_v17, %v2560_v22 }
 0x132   : > { %v2540_v11 = vrot.slane %v2458_v8, %v4280_v5 }
 0x133   : > { %v2406_v44 = vpop.xlane.xlu1 %2405 }
 0x134   : > { %v2463_v10 = vmul.f32 0.00077160494, %v2406_v44  ;;  %v2542_v32 = vsel %vm2541_vm2, %v2540_v11, %v2535_v27 }
 0x136   : > { %v2398_v45 = vpop.xlane.xlu0 %2397  ;;  %v2569_v23 = vrot.slane %v2463_v10, %v4287_v3 }
 0x137   : > { %v2459_v12 = vmul.f32 0.00077160494, %v2398_v45 }
 0x138   : > { %v2570_v37 = vsel %vm2548_vm3, %v2569_v23, %v2565_v31 }
 0x139   : > { %v2547_v25 = vrot.slane %v2459_v12, %v4287_v3 }
 0x13b   : > { %v2412_v46 = vpop.xlane.xlu1 %2411  ;;  %v2549_v24 = vsel %vm2548_vm3, %v2547_v25, %v2542_v32 }
 0x13c   : > { %v2466_v19 = vmul.f32 0.00077160494, %v2412_v46 }
 0x13e   : > { %v2410_v47 = vpop.xlane.xlu0 %2409  ;;  %v2583_v33 = vrot.slane %v2466_v19, %v4280_v5 }
 0x13f   : > { %v2465_v20 = vmul.f32 0.00077160494, %v2410_v47 }
 0x141   : > { %v2408_v48 = vpop.xlane.xlu1 %2407  ;;  %v2579_v34 = vrot.slane %v2465_v20, %v4284_v7 }
 0x142   : > { %v2464_v15 = vmul.f32 0.00077160494, %v2408_v48 }
 0x143   : > { %v2584_v46 = vsel %vm2541_vm2, %v2583_v33, %v2579_v34 }
 0x144   : > { %v2574_v28 = vrot.slane %v2464_v15, %v4290_v14 }
 0x146   : > { %v2400_v49 = vpop.xlane.xlu0 %2399  ;;  %v2575_v40 = vsel %vm2555_vm4, %v2574_v28, %v2570_v37 }
 0x147   : > { %v2460_v16 = vmul.f32 0.00077160494, %v2400_v49 }
 0x149   : > { %v2418_v50 = vpop.xlane.xlu1 %2417  ;;  %v2554_v29 = vrot.slane %v2460_v16, %v4290_v14 }
 0x14a   : > { %v2469_v42 = vmul.f32 0.00077160494, %v2418_v50 }
 0x14b   : > { %v2556_v41 = vsel %vm2555_vm4, %v2554_v29, %v2549_v24 }
 0x14c   : > { %v2414_v51 = vpop.xlane.xlu0 %2413  ;;  %v2691_v48 = vsel %vm2690_vm5, %v2575_v40, %v2556_v41 }
 0x14d   : > { %v2467_v26 = vmul.f32 0.00077160494, %v2414_v51 }
 0x14f   : > { %v2588_v38 = vrot.slane %v2467_v26, %v4287_v3 }
 0x150   : > { %v2416_v52 = vpop.xlane.xlu1 %2415 }
 0x151   : > { %v2468_v30 = vmul.f32 0.00077160494, %v2416_v52  ;;  %v2589_v49 = vsel %vm2548_vm3, %v2588_v38, %v2584_v46  ;;  %v2598_v52 = vrot.slane %v2469_v42, %v4284_v7 }
 0x153   : > { %v2593_v43 = vrot.slane %v2468_v30, %v4290_v14 }
 0x154   : > { %v2420_v53 = vpop.xlane.xlu0 %2419 }
 0x155   : > { %v2470_v35 = vmul.f32 0.00077160494, %v2420_v53  ;;  %v2594_v53 = vsel %vm2555_vm4, %v2593_v43, %v2589_v49 }
 0x156   : > { %v2693_v37 = vsel %vm2692_vm6, %v2594_v53, %v2691_v48 }
 0x157   : > { %v4255_v54 = vpop.xlane.xlu1 %2425  ;;  %v2602_v47 = vrot.slane %v2470_v35, %v4280_v5 }
 0x158   : > { %v2473_v51 = vmul.f32 0.00077160494, %v4255_v54 }
 0x159   : > { %v2603_v54 = vsel %vm2541_vm2, %v2602_v47, %v2598_v52  ;;  %v3148_v52 = vld [vmem:[#allocation6] ss:$0 sm:$0xff] }
 0x15b   : > { %v2422_v55 = vpop.xlane.xlu0 %2421 }
 0x15c   : > { %v2471_v45 = vmul.f32 0.00077160494, %v2422_v55 }
 0x15e   : > { %v2607_v55 = vrot.slane %v2471_v45, %v4287_v3 }
 0x160   : > { %v4257_v56 = vpop.xlane.xlu1 %2423  ;;  %v2608_v11 = vsel %vm2548_vm3, %v2607_v55, %v2603_v54 }
 0x161   : > { %v2472_v50 = vmul.f32 0.00077160494, %v4257_v56 }
 0x163   : > { %v4259_v57 = vpop.xlane.xlu0 %2427 }
 0x164   : > { %v2474_v62 = vmul.f32 0.00077160494, %v4259_v57  ;;  %v2617_v57 = vrot.slane %v2473_v51, %v4284_v7 }
 0x166   : > { %v4261_v58 = vpop.xlane.xlu1 %2433 }
 0x167   : > { %v2477_v0 = vmul.f32 0.00077160494, %v4261_v58  ;;  %v2612_v58 = vrot.slane %v2472_v50, %v4290_v14 }
 0x169   : > { %v4263_v59 = vpop.xlane.xlu0 %2429  ;;  %v2636_v20 = vrot.slane %v2477_v0, %v4284_v7  ;;  %v2613_v28 = vsel %vm2555_vm4, %v2612_v58, %v2608_v11  ;;  %v3151_v58 = vld [vmem:[#allocation9] ss:$0 sm:$0xff]  ;;  %v2816_v11 = vsub.s32 0, %v4271_v63 }
 0x16a   : > { %v2475_v2 = vmul.f32 0.00077160494, %v4263_v59  ;;  %v2621_v59 = vrot.slane %v2474_v62, %v4280_v5 }
 0x16c   : > { %v2622_v29 = vsel %vm2541_vm2, %v2621_v59, %v2617_v57 }
 0x16e   : > { %v4265_v60 = vpop.xlane.xlu1 %2431 }
 0x16f   : > { %v2476_v9 = vmul.f32 0.00077160494, %v4265_v60  ;;  %v2626_v60 = vrot.slane %v2475_v2, %v4287_v3 }
 0x171   : > { %v4267_v61 = vpop.xlane.xlu0 %2435  ;;  %v2627_v32 = vsel %vm2548_vm3, %v2626_v60, %v2622_v29  ;;  %v2812_v60 = vld [vmem:[#allocation12] sm:$0x7] }
 0x172   : > { %v2478_v6 = vmul.f32 0.00077160494, %v4267_v61 }
 0x175   : > { %v4274_v1 = vpop.xlane.xlu1 %2441 }
 0x176   : > { %v2481_v61 = vmul.f32 0.00077160494, %v4274_v1 }
 0x178   : > { %v4277_v4 = vpop.xlane.xlu0 %2437  ;;  %v2655_v30 = vrot.slane %v2481_v61, %v4284_v7 }
 0x179   : > { %v2479_v10 = vmul.f32 0.00077160494, %v4277_v4  ;;  %v2640_v4 = vrot.slane %v2478_v6, %v4280_v5 }
 0x17b   : > { %v2641_v33 = vsel %vm2541_vm2, %v2640_v4, %v2636_v20  ;;  %v2820_v4 = vsub.s32 1, %v4271_v63  ;;  %v2824_v20 = vsub.s32 2, %v4271_v63 }
 0x17c   : > { %v2440_v18 = vpop.xlane.xlu1 %2439 }
 0x17d   : > { %v2480_v13 = vmul.f32 0.00077160494, %v2440_v18  ;;  %v2631_v18 = vrot.slane %v2476_v9, %v4290_v14  ;;  %v2810_v9 = vld [vmem:[#allocation11 + $0x8] sm:$0xff] }
 0x17e   : > { %2862 = vmatprep.subr.mxu1 %v2810_v9 }
 0x17f   : > { %v2650_v25 = vrot.slane %v2480_v13, %v4290_v14 }
 0x180   : > { %v2444_v21 = vpop.xlane.xlu0 %2443 }
 0x181   : > { %v2482_v56 = vmul.f32 0.00077160494, %v2444_v21  ;;  %v2645_v21 = vrot.slane %v2479_v10, %v4287_v3  ;;  %v2809_v10 = vld [vmem:[#allocation11] sm:$0xff] }
 0x182   : > { %2863 = vmatpush1.msra.mxu1 %v2809_v10 }
 0x183   : > { %v2450_v39 = vpop.xlane.xlu1 %2449  ;;  %v2659_v22 = vrot.slane %v2482_v56, %v4280_v5  ;;  %v2646_v24 = vsel %vm2548_vm3, %v2645_v21, %v2641_v33  ;;  %3176 = vmatprep.subr.mxu1 %v3557_v36 }
 0x184   : > { %v2485_v19 = vmul.f32 0.00077160494, %v2450_v39  ;;  %v2651_v40 = vsel %vm2555_vm4, %v2650_v25, %v2646_v24 }
 0x185   : > { %v2660_v38 = vsel %vm2541_vm2, %v2659_v22, %v2655_v30 }
 0x186   : > { %v2674_v34 = vrot.slane %v2485_v19, %v4284_v7  ;;  %v2695_v7 = vsel %vm2694_vm7, %v2613_v28, %v2693_v37  ;;  %v2817_v19 = vrot.slane %v2812_v60, %v2816_v11 }
 0x187   : > { %v2446_v44 = vpop.xlane.xlu0 %2445 }
 0x188   : > { %v2483_v15 = vmul.f32 0.00077160494, %v2446_v44 }
 0x18a   : > { %v2664_v1 = vrot.slane %v2483_v15, %v4287_v3  ;;  %v3150_v15 = vld [vmem:[#allocation8] ss:$0 sm:$0xff] }
 0x18c   : > { %v2448_v8 = vpop.xlane.xlu1 %2447  ;;  %v2665_v41 = vsel %vm2548_vm3, %v2664_v1, %v2660_v38 }
 0x18d   : > { %v2484_v17 = vmul.f32 0.00077160494, %v2448_v8 }
 0x18f   : > { %v2452_v12 = vpop.xlane.xlu0 %2451  ;;  %v2669_v31 = vrot.slane %v2484_v17, %v4290_v14  ;;  %v2811_v17 = vld [vmem:[#allocation11 + $0x10] sm:$0xff] }
 0x190   : > { %v2486_v16 = vmul.f32 0.00077160494, %v2452_v12 }
 0x192   : > { %v2678_v26 = vrot.slane %v2486_v16, %v4280_v5  ;;  %v2632_v5 = vsel %vm2555_vm4, %v2631_v18, %v2627_v32  ;;  %v2821_v18 = vrot.slane %v2812_v60, %v2820_v4 }
 0x193   : > { %v2454_v23 = vpop.xlane.xlu0 %2453  ;;  %v2697_v45 = vsel %vm2696_vm8, %v2632_v5, %v2695_v7 }
 0x194   : > { %v2487_v27 = vmul.f32 0.00077160494, %v2454_v23  ;;  %v2679_v42 = vsel %vm2541_vm2, %v2678_v26, %v2674_v34  ;;  %v2699_v47 = vsel %vm2698_vm9, %v2651_v40, %v2697_v45  ;;  %v2825_v23 = vrot.slane %v2812_v60, %v2824_v20 }
 0x196   : > { %v2683_v35 = vrot.slane %v2487_v27, %v4287_v3  ;;  %v2456_v39 = vpop.xlane.xlu1 %2455  ;;  %v2670_v3 = vsel %vm2555_vm4, %v2669_v31, %v2665_v41 }
 0x197   : > { %v2488_v43 = vmul.f32 0.00077160494, %v2456_v39  ;;  %v2701_v49 = vsel %vm2700_vm10, %v2670_v3, %v2699_v47 }
 0x198   : > { %v2684_v44 = vsel %vm2548_vm3, %v2683_v35, %v2679_v42 }
 0x199   : > { %v2688_v46 = vrot.slane %v2488_v43, %v4290_v14 }
 0x19b   : > { %v2689_v48 = vsel %vm2555_vm4, %v2688_v46, %v2684_v44 }
 0x19c   : > { %v2703_v51 = vsel %vm2702_vm11, %v2689_v48, %v2701_v49 }
 0x19d   : > { %3174 = vmatmul.mubr.msk.f32.vlgmr.msra.gmra.mxu0 %vm2704_vm12, %v2703_v51 }
 0x25d   : > { %v2773_v53 = vpop.f32.mrf.mxu0 }
 0x25e   : > { %v2774_v50 = vadd.f32 %v3148_v52, %v2773_v53 }
 0x25f   : > { %v3175_v62 = vpop.f32.mrf.mxu0 }
 0x260   : > { %v2777_v55 = vmax.f32 %v2774_v50, 0.0 }
 0x262   : > { %v2779_v0 = vsel %vm2778_vm13, %v2777_v55, 0.0 }
 0x263   : > { %2780 = vadd.xlane.f32.xlu0 %v2779_v0 }
 0x2ec   : > { %v2781_v2 = vpop.xlane.xlu0 %2780 }
 0x2ed   : > { %v2783_v14 = vmul.f32 0.125, %v2781_v2 }
 0x2ef   : > { %v2784_v6 = vsub.f32 %v2777_v55, %v2783_v14 }
 0x2f1   : > { %v2785_v8 = vmul.f32 %v2784_v6, %v2784_v6 }
 0x2f3   : > { %v2786_v54 = vsel %vm2778_vm13, %v2785_v8, 0.0 }
 0x2f4   : > { %2787 = vadd.xlane.f32.xlu1 %v2786_v54 }
 0x37d   : > { %v2788_v56 = vpop.xlane.xlu1 %2787 }
 0x37e   : > { %v2789_v12 = vmul.f32 0.125, %v2788_v56 }
 0x380   : > { %v2790_v57 = vadd.f32 1e-06, %v2789_v12 }
 0x382   : > { %3297 = vrsqrt.f32 %v2790_v57 }
 0x38f   : > { %v3298_v13 = vpop.eup %3297 }
 0x390   : > { %v2792_v16 = vmul.f32 %v3298_v13, %v2784_v6 }
 0x392   : > { %v2800_v59 = vmul.f32 %v3150_v15, %v2792_v16 }
 0x394   : > { %v2808_v61 = vadd.f32 %v3151_v58, %v2800_v59 }
 0x396   : > { %3152 = vmatmul.mubr.msk.f32.vlgmr.msra.gmra.mxu1 %vm2778_vm13, %v2808_v61 }
 0x397   : > { %3177 = vmatpush3.msra.mxu1 %v2811_v17  ;;  %3178 = vmatprep.mubr.msk.f32.mxu1 %vm3558_vm1, %v3557_v36 }
 0x39a   : > { %3179 = vmatmul.mubr.msk.f32.vlgmr.msra.gmra.mxu1 %vm2778_vm13, %v2808_v61 }
 0x456   : > { %v2898_v21 = vpop.f32.mrf.mxu1 }
 0x457   : > { %v2899_v22 = vadd.f32 %v2898_v21, %v2817_v19 }
 0x458   : > { %v2900_v25 = vpop.f32.mrf.mxu1 }
 0x459   : > { %v2973_v1 = vmax.f32 %v2899_v22, 0.0  ;;  %v2901_v26 = vadd.f32 %v2900_v25, %v2821_v18 }
 0x45a   : > { %v2969_v36 = vpop.f32.mrf.mxu1 }
 0x45b   : > { %2976 = vst [vmem:[%s385_s21] sm:$0xff] %v2973_v1  ;;  %v2974_v27 = vmax.f32 %v2901_v26, 0.0  ;;  %v2970_v28 = vadd.f32 %v2969_v36, %v2825_v23 }
 0x45c   : > { %v3180_v29 = vpop.f32.mrf.mxu1 }
 0x45d   : > { %2977 = vst [vmem:[%s385_s21 + $0x8] sm:$0xff] %v2974_v27  ;;  %v2975_v63 = vmax.f32 %v2970_v28, 0.0 }
 0x45f   : > { %2978 = vst [vmem:[%s385_s21 + $0x10] sm:$0xff] %v2975_v63 }
 0x460   : > { %3468 = shalt.err (!%p3465_p9)
}
 0x461   : > { %s3469_s10 = scalar_lea.hbm %s2992_s12, 384  ;;  %s3473_s9 = scalar_lea.hbm %s4419_s7, 768 }
 0x462   : > { %p3470_p6 = scmp.ne.s32.totalorder %s2992_s12, %s3469_s10  ;;  %p3474_p3 = scmp.lt.s32.totalorder %s2992_s12, %s4419_s7 }
 0x463   : > { %p3475_p2 = scmp.lt.s32.totalorder %s3473_s9, %s3469_s10 }
 0x464   : > { %p3471_p7 = pnand %p3470_p6, %p4433_p8 }
 0x465   : > { %p3476_p12 = por %p3475_p2, %p3474_p3 }
 0x466   : > { %p3472_p10 = pneg %p3471_p7 }
 0x468   : > { %p3477_p5 = pnand %p3476_p12, %p3472_p10 }
 0x46a   : > { %3480 = shalt.err (!%p3477_p5)
}
 0x46b   : > { %3207 = dma.vmem_to_hbm [thread:$0]  (%p4433_p8), %s2995_s8, 384, %s2992_s12, %s2980_s14  }
 0x46c PF: > { %s3006_s21 = sand.u32 1, %s3527_s24   ;;  %p4434_p0 = scmp.ne.s32.totalorder %s4429_s17, 0 }
 0x46d   : > { %p4435_p11 = scmp.ge.s32.totalorder %s3547_s29, 2  ;;  %s3007_s16 = scalar_lea.sflag [#allocation5], %s3006_s21 }
 0x46f   : > { %p3226_p4 = pnand %p4435_p11, %p4434_p0 }
 0x471   : > { %p3227_p13 = pneg %p3226_p4 }
 0x473   : > { %3522 = dma.done.wait (%p3227_p13), %s3007_s16, 384  }
 0x474   : > { %3524 = vsyncadd (%p3227_p13), %s3007_s16, 4294966912  ;;  %s26_s29 = sadd.s32 1, %s3547_s29   ;;  %s4436_s11 = sld [smem:[#allocation21_spill]] }
 0x475   : > { %p23_p1 = scmp.ge.s32.totalorder %s26_s29, 4   ;;  %s4437_s15 = sld [smem:[#allocation20_spill]] }
 0x476   : > { %s4438_s24 = smov %s3531_s25  ;;  %s4439_s25 = smov %s3535_s26 }
 0x477   : > { %s4441_s27 = smov %s3543_s28  ;;  %25 = sbr.rel (!%p23_p1) target bundleno = 9 (0x9), region = 125 }
 0x47a   : > { %s4440_s26 = smov %s4436_s11 }
 0x47b   : > { %s4442_s28 = smov %s4437_s15 }
 0x47c   :  { %3012 = vsyncpa [#allocation4], 1 }
 0x47d   :  { %3014 = vsyncpa [#allocation4 + $0x1], 1 }
 0x47e   :  { %3015 = vsyncpa [#allocation7], 1 }
 0x47f   :  { %3016 = vsyncpa [#allocation10], 1 }
 0x480   :  { %3017 = vsyncpa [#allocation13], 1 }
 0x481   :  { %3018 = vsyncpa [#allocation5], 1 }
 0x482   :  { %3020 = vsyncpa [#allocation5 + $0x1], 1 }

</bundles_post_ra>
